<compile_context>
chip_gen: v7x
topology: tpu7x:2x2x1
jax: 0.10.0
libtpu: 0.0.40
codegen_flags: <defaults>
</compile_context>

<pallas_src>
import functools

import jax
import jax.numpy as jnp
from jax.experimental import pallas as pl
from jax.experimental.pallas import tpu as pltpu


# ----------------------------- in-kernel helpers ------------------------------

def _erf(x):
    # Abramowitz & Stegun 7.1.26 rational approximation, |err| <= 1.5e-7.
    # Built only from VPU/EUP-friendly ops (abs, mul/add, exp, select).
    a1, a2, a3, a4, a5 = (0.254829592, -0.284496736, 1.421413741,
                          -1.453152027, 1.061405429)
    p = 0.3275911
    sgn = jnp.where(x >= 0.0, 1.0, -1.0)
    ax = jnp.abs(x)
    t = 1.0 / (1.0 + p * ax)
    poly = ((((a5 * t + a4) * t + a3) * t + a2) * t + a1) * t
    return sgn * (1.0 - poly * jnp.exp(-ax * ax))


def _gelu_exact(u):
    return 0.5 * u * (1.0 + _erf(u * jnp.float32(0.7071067811865475)))


def _layernorm(z, g, b, eps=1e-12):
    mu = jnp.mean(z, axis=-1, keepdims=True)
    var = jnp.mean((z - mu) ** 2, axis=-1, keepdims=True)
    return (z - mu) * jax.lax.rsqrt(var + eps) * g + b


# ----------------------- fused transformer-layer kernel ----------------------
# grid = (B, L): batch axis "parallel" (v7x megacore), layer axis "arbitrary".
# o_ref (constant block index across the layer axis) carries the hidden state.

def _encoder_kernel(h_ref, kb_ref, wa_ref, wf_ref, bl_ref, o_ref, *, nh, H, I):
    l = pl.program_id(1)
    hd = H // nh

    @pl.when(l == 0)
    def _():
        o_ref[...] = h_ref[...]

    x = o_ref[...]                      # (S, H) carried hidden state
    key_bias = kb_ref[0]                # (1, S) additive mask bias per key
    wa = wa_ref[0]                      # (H, 4H): [Wq*s | Wk | Wv | Wo]
    wf = wf_ref[0]                      # (I, I+H): Wi in [:H,:I], Wo2 in [:, I:]
    bl = bl_ref[0]                      # (8, W) bias / layernorm slab

    # ---- self-attention: one fused QKV matmul, per-head softmax, one Wo ----
    qkv = jnp.dot(x, wa[:, :3 * H],
                  preferred_element_type=jnp.float32) + bl[0:1, :3 * H]
    ctx_heads = []
    for h in range(nh):
        q = qkv[:, h * hd:(h + 1) * hd]                    # already 1/sqrt(hd)-scaled
        k = qkv[:, H + h * hd:H + (h + 1) * hd]
        v = qkv[:, 2 * H + h * hd:2 * H + (h + 1) * hd]
        s = jax.lax.dot_general(q, k, (((1,), (1,)), ((), ())),
                                preferred_element_type=jnp.float32) + key_bias
        m = jnp.max(s, axis=-1, keepdims=True)
        e = jnp.exp(s - m)
        p = e * pl.reciprocal(jnp.sum(e, axis=-1, keepdims=True), approx=True)
        ctx_heads.append(jnp.dot(p, v, preferred_element_type=jnp.float32))
    ctx = jnp.concatenate(ctx_heads, axis=-1)              # (S, H)
    attn = jnp.dot(ctx, wa[:, 3 * H:],
                   preferred_element_type=jnp.float32) + bl[1:2, :H]

    h1 = _layernorm(x + attn, bl[2:3, :H], bl[3:4, :H])

    # ---- feed-forward with exact (erf) GELU ----
    u = jnp.dot(h1, wf[:H, :I], preferred_element_type=jnp.float32) + bl[4:5, :I]
    u = _gelu_exact(u)
    ffn = jnp.dot(u, wf[:, I:], preferred_element_type=jnp.float32) + bl[5:6, :H]

    o_ref[...] = _layernorm(h1 + ffn, bl[6:7, :H], bl[7:8, :H])


def encoder_pallas(h0, key_bias, packed, cfg):
    BS, H = h0.shape
    L, nh, I = cfg["layers"], cfg["heads"], cfg["inter"]
    B = key_bias.shape[0]
    S = BS // B
    W = max(3 * H, I)

    return pl.pallas_call(
        functools.partial(_encoder_kernel, nh=nh, H=H, I=I),
        out_shape=jax.ShapeDtypeStruct((BS, H), jnp.float32),
        grid_spec=pltpu.PrefetchScalarGridSpec(
            num_scalar_prefetch=0,
            grid=(B, L),
            in_specs=[
                pl.BlockSpec((S, H), lambda b, l: (b, 0)),          # h0 rows of batch b
                pl.BlockSpec((1, 1, S), lambda b, l: (b, 0, 0)),    # key bias row
                pl.BlockSpec((1, H, 4 * H), lambda b, l: (l, 0, 0)),
                pl.BlockSpec((1, I, I + H), lambda b, l: (l, 0, 0)),
                pl.BlockSpec((1, 8, W), lambda b, l: (l, 0, 0)),
            ],
            out_specs=pl.BlockSpec((S, H), lambda b, l: (b, 0)),
        ),
        compiler_params=pltpu.CompilerParams(
            dimension_semantics=("parallel", "arbitrary")),
    )(h0, key_bias, packed["w_attn"], packed["w_ffn"], packed["biasln"])


# ------------- fused MLM head + span-FC head + event-logit kernel ------------
# One dispatch: mlm CE (mean over B*S rows), fc CE (mean over B*E rows), and
# the (B,E) event logits via one-hot selection matmuls.  Full (BS,V) logits
# never leave VMEM.

def _heads_kernel(x_ref, mw_ref, mb_ref, ids_ref, evsel_ref, mrow_ref,
                  srow_ref, fw_ref, fb_ref, lbl_ref, loss_ref, ev_ref):
    x = x_ref[...]                                                       # (BS, H)
    z = jnp.dot(x, mw_ref[...], preferred_element_type=jnp.float32) + mb_ref[...]

    def ce_rows(logits, tgt):
        m = jnp.max(logits, axis=-1, keepdims=True)
        lse = m + jnp.log(jnp.sum(jnp.exp(logits - m), axis=-1, keepdims=True))
        col = jax.lax.broadcasted_iota(jnp.int32, logits.shape, 1)
        picked = jnp.sum(jnp.where(col == tgt, logits, 0.0),
                         axis=-1, keepdims=True)
        return lse - picked                                              # (M, 1)

    # masked-LM loss: CE of every position's logits vs input_ids (as in spec)
    mlm_ce = ce_rows(z, ids_ref[...])
    mlm_mean = jnp.sum(mlm_ce, axis=0, keepdims=True) * (1.0 / z.shape[0])

    # event logits: rows at mask_position, columns event_ids (one-hot matmuls)
    ev_cols = jnp.dot(z, evsel_ref[...], preferred_element_type=jnp.float32)
    ev_ref[...] = jnp.dot(mrow_ref[...], ev_cols,
                          preferred_element_type=jnp.float32)            # (B, E)

    # span head: gather the E event-token rows per batch, then fc + CE
    ev_x = jnp.dot(srow_ref[...], x, preferred_element_type=jnp.float32)  # (BE, H)
    g = jnp.dot(ev_x, fw_ref[...], preferred_element_type=jnp.float32) + fb_ref[...]
    fc_ce = ce_rows(g, lbl_ref[...])
    fc_mean = jnp.sum(fc_ce, axis=0, keepdims=True) * (1.0 / g.shape[0])

    loss_ref[...] = mlm_mean + fc_mean                                   # (1, 1)


def heads_pallas(x, mlm_w, mlm_b, ids, evcol_sel, maskrow_sel, seprow_sel,
                 fc_w, fc_b, label):
    B, E = maskrow_sel.shape[0], evcol_sel.shape[1]

    def full(arr):
        shp = arr.shape
        return pl.BlockSpec(shp, lambda i: (0,) * len(shp))

    ins = (x, mlm_w, mlm_b, ids, evcol_sel, maskrow_sel, seprow_sel,
           fc_w, fc_b, label)
    return pl.pallas_call(
        _heads_kernel,
        out_shape=(jax.ShapeDtypeStruct((1, 1), jnp.float32),
                   jax.ShapeDtypeStruct((B, E), jnp.float32)),
        grid_spec=pltpu.PrefetchScalarGridSpec(
            num_scalar_prefetch=0,
            grid=(1,),
            in_specs=[full(a) for a in ins],
            out_specs=[pl.BlockSpec((1, 1), lambda i: (0, 0)),
                       pl.BlockSpec((B, E), lambda i: (0, 0))],
        ),
        compiler_params=pltpu.CompilerParams(dimension_semantics=("arbitrary",)),
    )(*ins)


# ------------------------------- JAX glue ------------------------------------

def _logsumexp(x):
    m = jnp.max(x)
    return m + jnp.log(jnp.sum(jnp.exp(x - m)))


def layer_norm(x, gamma, beta, eps=1e-12):
    mu = jnp.mean(x, axis=-1, keepdims=True)
    var = jnp.mean((x - mu) ** 2, axis=-1, keepdims=True)
    return (x - mu) * jax.lax.rsqrt(var + eps) * gamma + beta


def loss_fun(event_output, label):
    """Vectorised equivalent of Loss_fun.forward (per-row masked log-softmax)."""
    def per_row(i, j):  # i: (E,) float logits, j: (E,) int {0,1} target
        # branch j[0] != 0:  -log_softmax(i)[0]
        case1 = _logsumexp(i) - i[0]

        # branch j[0] == 0:
        pos_mask = (j != 0)                       # real positives (index 0 excluded)
        pos_subset = pos_mask.at[0].set(True)     # temporarily include index 0
        neg_mask = (j == 0)                       # includes index 0
        neg_inf = jnp.float32(-1e30)
        lse_pos = _logsumexp(jnp.where(pos_subset, i, neg_inf))
        lse_neg = _logsumexp(jnp.where(neg_mask, i, neg_inf))
        n_pos = jnp.maximum(jnp.sum(pos_mask.astype(jnp.float32)), 1.0)
        loss_positive = jnp.sum(jnp.where(pos_mask, lse_pos - i, 0.0)) / n_pos
        loss_negative = lse_neg - i[0]
        case2 = loss_positive + loss_negative

        return jnp.where(j[0] != 0, case1, case2)

    per = jax.vmap(per_row)(event_output, label)
    return jnp.mean(per)


def ed_bert_forward(packed, input_ids, attention_mask, token_type_ids,
                    mask_position, sep_position, label, cfg):
    B, S = input_ids.shape
    H, V = cfg["hidden"], cfg["vocab"]
    E = len(cfg["event_ids"])
    BS = B * S
    event_ids = jnp.asarray(cfg["event_ids"], jnp.int32)

    # ---- embeddings + embedding layernorm (gathers; plain JAX glue) ----
    emb = (packed["word_emb"][input_ids]
           + packed["pos_emb"][jnp.arange(S)][None, :, :]
           + packed["type_emb"][token_type_ids])
    h0 = layer_norm(emb, packed["emb_ln_g"], packed["emb_ln_b"]).reshape(BS, H)

    # per-batch additive key bias (BERT extended attention mask), O(B*S) only
    key_bias = ((1.0 - attention_mask.astype(jnp.float32))
                * jnp.float32(-10000.0)).reshape(B, 1, S)

    # ---- fused BERT encoder: all layers, all batches, one pallas_call ----
    seq2d = encoder_pallas(h0, key_bias, packed, cfg)          # (BS, H)

    # ---- selection matrices so all gathers become in-kernel one-hot matmuls ----
    rows = jnp.arange(BS, dtype=jnp.int32)
    mask_rows = jnp.arange(B, dtype=jnp.int32) * S + mask_position            # (B,)
    maskrow_sel = (mask_rows[:, None] == rows[None, :]).astype(jnp.float32)   # (B, BS)
    sep_rows = (jnp.arange(B, dtype=jnp.int32)[:, None] * S
                + sep_position[:, None]
                + jnp.arange(E, dtype=jnp.int32)[None, :]).reshape(B * E)
    seprow_sel = (sep_rows[:, None] == rows[None, :]).astype(jnp.float32)     # (B*E, BS)
    evcol_sel = (jnp.arange(V, dtype=jnp.int32)[:, None]
                 == event_ids[None, :]).astype(jnp.float32)                   # (V, E)

    # ---- fused heads: mlm CE + fc CE (scalar) + (B,E) event logits ----
    head_loss, event_output = heads_pallas(
        seq2d, packed["mlm_w"], packed["mlm_b"],
        input_ids.reshape(BS, 1).astype(jnp.int32),
        evcol_sel, maskrow_sel, seprow_sel,
        packed["fc_w"], packed["fc_b"],
        label.reshape(B * E, 1).astype(jnp.int32))

    return loss_fun(event_output, label) + head_loss[0, 0]


# ------------------------------ init / packing -------------------------------

def init_params(key, cfg):
    H, V, L, I = cfg["hidden"], cfg["vocab"], cfg["layers"], cfg["inter"]
    keys = iter(jax.random.split(key, 128))

    def nrm(shape):
        return jax.random.normal(next(keys), shape, jnp.float32) * 0.02

    params = dict(
        word_emb=nrm((V, H)),
        pos_emb=nrm((cfg["max_pos"], H)),
        type_emb=nrm((2, H)),
        emb_ln_g=jnp.ones((H,), jnp.float32),
        emb_ln_b=jnp.zeros((H,), jnp.float32),
        mlm_w=nrm((H, V)), mlm_b=jnp.zeros((V,), jnp.float32),
        fc_w=nrm((H, 2)), fc_b=jnp.zeros((2,), jnp.float32),
        layers=[],
    )
    for _ in range(L):
        params["layers"].append(dict(
            wq=nrm((H, H)), bq=jnp.zeros((H,), jnp.float32),
            wk=nrm((H, H)), bk=jnp.zeros((H,), jnp.float32),
            wv=nrm((H, H)), bv=jnp.zeros((H,), jnp.float32),
            wo=nrm((H, H)), bo=jnp.zeros((H,), jnp.float32),
            ln1_g=jnp.ones((H,), jnp.float32), ln1_b=jnp.zeros((H,), jnp.float32),
            wi=nrm((H, I)), bi=jnp.zeros((I,), jnp.float32),
            wo2=nrm((I, H)), bo2=jnp.zeros((H,), jnp.float32),
            ln2_g=jnp.ones((H,), jnp.float32), ln2_b=jnp.zeros((H,), jnp.float32),
        ))
    return params


def pack_params(params, cfg):
    """One-time repack into the fused-kernel layout:
    w_attn (L,H,4H), w_ffn (L,I,I+H), biasln (L,8,max(3H,I));
    1/sqrt(hd) folded into Wq/bq."""
    H, I, nh = cfg["hidden"], cfg["inter"], cfg["heads"]
    hd = H // nh
    assert I >= H, "packing assumes intermediate size >= hidden size"
    scale = 1.0 / float(hd) ** 0.5
    W = max(3 * H, I)

    def row(v):
        return jnp.zeros((W,), jnp.float32).at[:v.shape[0]].set(v)

    w_attn, w_ffn, biasln = [], [], []
    for lp in params["layers"]:
        w_attn.append(jnp.concatenate(
            [lp["wq"] * scale, lp["wk"], lp["wv"], lp["wo"]], axis=1))   # (H, 4H)
        wf = jnp.zeros((I, I + H), jnp.float32)
        wf = wf.at[:H, :I].set(lp["wi"]).at[:, I:].set(lp["wo2"])
        w_ffn.append(wf)                                                 # (I, I+H)
        biasln.append(jnp.stack([
            row(jnp.concatenate([lp["bq"] * scale, lp["bk"], lp["bv"]])),
            row(lp["bo"]), row(lp["ln1_g"]), row(lp["ln1_b"]),
            row(lp["bi"]), row(lp["bo2"]), row(lp["ln2_g"]), row(lp["ln2_b"]),
        ]))                                                              # (8, W)

    packed = dict(
        w_attn=jnp.stack(w_attn),
        w_ffn=jnp.stack(w_ffn),
        biasln=jnp.stack(biasln),
        word_emb=params["word_emb"], pos_emb=params["pos_emb"],
        type_emb=params["type_emb"],
        emb_ln_g=params["emb_ln_g"], emb_ln_b=params["emb_ln_b"],
        mlm_w=params["mlm_w"], mlm_b=params["mlm_b"].reshape(1, -1),
        fc_w=params["fc_w"], fc_b=params["fc_b"].reshape(1, -1),
    )
    return packed


# ---------------------------------- main --------------------------------------

if __name__ == "__main__":
    cfg = dict(vocab=64, hidden=32, layers=2, heads=2, inter=64, max_pos=32,
               event_ids=(5, 6, 7, 8))
    B, S = 2, 16

    key = jax.random.PRNGKey(0)
    kp, ki = jax.random.split(key)
    params = init_params(kp, cfg)
    packed = pack_params(params, cfg)

    input_ids = jax.random.randint(ki, (B, S), 0, cfg["vocab"], dtype=jnp.int32)
    attention_mask = jnp.ones((B, S), jnp.int32)
    token_type_ids = jnp.zeros((B, S), jnp.int32)
    mask_position = jnp.array([3, 5], jnp.int32)
    sep_position = jnp.array([8, 10], jnp.int32)   # sep + E <= S
    label = jnp.array([[1, 0, 0, 0],
                       [0, 1, 0, 1]], jnp.int32)   # exercises both Loss_fun branches

    fwd = jax.jit(functools.partial(ed_bert_forward, cfg=cfg))
    loss = fwd(packed, input_ids, attention_mask, token_type_ids,
               mask_position, sep_position, label)
    jax.block_until_ready(loss)
    assert loss.shape == () and jnp.isfinite(loss)
    print("KERNEL_OK")
</pallas_src>

<mosaic_0001>
module attributes {stable_mosaic.version = 11 : i64} {
  func.func @_encoder_kernel(%arg0: i32, %arg1: i32, %arg2: memref<16x32xf32, #tpu.memory_space<vmem>>, %arg3: memref<1x1x16xf32, #tpu.memory_space<vmem>>, %arg4: memref<1x32x128xf32, #tpu.memory_space<vmem>>, %arg5: memref<1x64x96xf32, #tpu.memory_space<vmem>>, %arg6: memref<1x8x96xf32, #tpu.memory_space<vmem>>, %arg7: memref<16x32xf32, #tpu.memory_space<vmem>>) attributes {dimension_semantics = [#tpu.dimension_semantics<parallel>, #tpu.dimension_semantics<arbitrary>], iteration_bounds = array<i64: 2, 2>, scalar_prefetch = 0 : i64, scratch_operands = 0 : i64, tpu.core_type = #tpu.core_type<tc>, window_params = [{transform_indices = @transform_0, window_bounds = array<i64: 16, 32>}, {transform_indices = @transform_1, window_bounds = array<i64: 1, 1, 16>}, {transform_indices = @transform_2, window_bounds = array<i64: 1, 32, 128>}, {transform_indices = @transform_3, window_bounds = array<i64: 1, 64, 96>}, {transform_indices = @transform_4, window_bounds = array<i64: 1, 8, 96>}, {transform_indices = @transform_5, window_bounds = array<i64: 16, 32>}]} {
    %c0_i32 = arith.constant 0 : i32
    %0 = arith.cmpi eq, %arg1, %c0_i32 : i32
    %1 = arith.extui %0 : i1 to i32
    %c0_i32_0 = arith.constant 0 : i32
    %2 = arith.cmpi ne, %1, %c0_i32_0 : i32
    scf.if %2 {
      %c0_53 = arith.constant 0 : index
      %c0_54 = arith.constant 0 : index
      %159 = vector.load %arg2[%c0_53, %c0_54] : memref<16x32xf32, #tpu.memory_space<vmem>>, vector<16x32xf32>
      %c0_55 = arith.constant 0 : index
      %c0_56 = arith.constant 0 : index
      %160 = vector.load %arg7[%c0_55, %c0_56] : memref<16x32xf32, #tpu.memory_space<vmem>>, vector<16x32xf32>
      tpu.vector_store %arg7[%c0_55, %c0_56], %159 {strides = array<i32>} : memref<16x32xf32, #tpu.memory_space<vmem>>, vector<16x32xf32>,
    } else {
    }
    %c0 = arith.constant 0 : index
    %c0_1 = arith.constant 0 : index
    %3 = vector.load %arg7[%c0, %c0_1] : memref<16x32xf32, #tpu.memory_space<vmem>>, vector<16x32xf32>
    %c0_2 = arith.constant 0 : index
    %c0_3 = arith.constant 0 : index
    %c0_4 = arith.constant 0 : index
    %4 = vector.load %arg3[%c0_2, %c0_3, %c0_4] : memref<1x1x16xf32, #tpu.memory_space<vmem>>, vector<1x1x16xf32>
    %5 = vector.shape_cast %4 : vector<1x1x16xf32> to vector<1x16xf32>
    %c0_5 = arith.constant 0 : index
    %c0_6 = arith.constant 0 : index
    %c0_7 = arith.constant 0 : index
    %6 = vector.load %arg4[%c0_5, %c0_6, %c0_7] : memref<1x32x128xf32, #tpu.memory_space<vmem>>, vector<1x32x128xf32>
    %7 = vector.shape_cast %6 : vector<1x32x128xf32> to vector<32x128xf32>
    %c0_8 = arith.constant 0 : index
    %c0_9 = arith.constant 0 : index
    %c0_10 = arith.constant 0 : index
    %8 = vector.load %arg5[%c0_8, %c0_9, %c0_10] : memref<1x64x96xf32, #tpu.memory_space<vmem>>, vector<1x64x96xf32>
    %9 = vector.shape_cast %8 : vector<1x64x96xf32> to vector<64x96xf32>
    %c0_11 = arith.constant 0 : index
    %c0_12 = arith.constant 0 : index
    %c0_13 = arith.constant 0 : index
    %10 = vector.load %arg6[%c0_11, %c0_12, %c0_13] : memref<1x8x96xf32, #tpu.memory_space<vmem>>, vector<1x8x96xf32>
    %11 = vector.shape_cast %10 : vector<1x8x96xf32> to vector<8x96xf32>
    %12 = vector.extract_strided_slice %7 {offsets = [0, 0], sizes = [32, 96], strides = [1, 1]} : vector<32x128xf32> to vector<32x96xf32>
    %cst = arith.constant dense<0.000000e+00> : vector<16x96xf32>
    %13 = tpu.matmul %3, %12, %cst {dimension_numbers = #tpu.dot_dimension_numbers<[1], [0], [0], [1], [0, 0, 1, 1], [], []>} : vector<16x32xf32>, vector<32x96xf32>, vector<16x96xf32> -> vector<16x96xf32>
    %14 = vector.extract_strided_slice %11 {offsets = [0, 0], sizes = [1, 96], strides = [1, 1]} : vector<8x96xf32> to vector<1x96xf32>
    %15 = vector.broadcast %14 : vector<1x96xf32> to vector<16x96xf32>
    %16 = arith.addf %13, %15 : vector<16x96xf32>
    %17 = vector.extract_strided_slice %16 {offsets = [0, 0], sizes = [16, 16], strides = [1, 1]} : vector<16x96xf32> to vector<16x16xf32>
    %18 = vector.extract_strided_slice %16 {offsets = [0, 32], sizes = [16, 16], strides = [1, 1]} : vector<16x96xf32> to vector<16x16xf32>
    %19 = vector.extract_strided_slice %16 {offsets = [0, 64], sizes = [16, 16], strides = [1, 1]} : vector<16x96xf32> to vector<16x16xf32>
    %cst_14 = arith.constant dense<0.000000e+00> : vector<16x16xf32>
    %20 = tpu.matmul %17, %18, %cst_14 {dimension_numbers = #tpu.dot_dimension_numbers<[1], [1], [0], [0], [0, 0, 1, 0], [], []>} : vector<16x16xf32>, vector<16x16xf32>, vector<16x16xf32> -> vector<16x16xf32>
    %21 = vector.broadcast %5 : vector<1x16xf32> to vector<16x16xf32>
    %22 = arith.addf %20, %21 : vector<16x16xf32>
    %cst_15 = arith.constant dense<0xFF800000> : vector<16xf32>
    %23 = vector.multi_reduction <maximumf>, %22, %cst_15 [1] : vector<16x16xf32> to vector<16xf32>
    %24 = vector.shape_cast %23 : vector<16xf32> to vector<16x1xf32>
    %25 = vector.broadcast %24 : vector<16x1xf32> to vector<16x16xf32>
    %26 = arith.subf %22, %25 : vector<16x16xf32>
    %27 = math.exp %26 : vector<16x16xf32>
    %cst_16 = arith.constant dense<0.000000e+00> : vector<16xf32>
    %28 = vector.multi_reduction <add>, %27, %cst_16 [1] : vector<16x16xf32> to vector<16xf32>
    %29 = vector.shape_cast %28 : vector<16xf32> to vector<16x1xf32>
    %30 = tpu.reciprocal %29 {approx = true} : vector<16x1xf32> -> vector<16x1xf32>
    %31 = vector.broadcast %30 : vector<16x1xf32> to vector<16x16xf32>
    %32 = arith.mulf %27, %31 : vector<16x16xf32>
    %cst_17 = arith.constant dense<0.000000e+00> : vector<16x16xf32>
    %33 = tpu.matmul %32, %19, %cst_17 {dimension_numbers = #tpu.dot_dimension_numbers<[1], [0], [0], [1], [0, 0, 1, 1], [], []>} : vector<16x16xf32>, vector<16x16xf32>, vector<16x16xf32> -> vector<16x16xf32>
    %34 = vector.extract_strided_slice %16 {offsets = [0, 16], sizes = [16, 16], strides = [1, 1]} : vector<16x96xf32> to vector<16x16xf32>
    %35 = vector.extract_strided_slice %16 {offsets = [0, 48], sizes = [16, 16], strides = [1, 1]} : vector<16x96xf32> to vector<16x16xf32>
    %36 = vector.extract_strided_slice %16 {offsets = [0, 80], sizes = [16, 16], strides = [1, 1]} : vector<16x96xf32> to vector<16x16xf32>
    %cst_18 = arith.constant dense<0.000000e+00> : vector<16x16xf32>
    %37 = tpu.matmul %34, %35, %cst_18 {dimension_numbers = #tpu.dot_dimension_numbers<[1], [1], [0], [0], [0, 0, 1, 0], [], []>} : vector<16x16xf32>, vector<16x16xf32>, vector<16x16xf32> -> vector<16x16xf32>
    %38 = vector.broadcast %5 : vector<1x16xf32> to vector<16x16xf32>
    %39 = arith.addf %37, %38 : vector<16x16xf32>
    %cst_19 = arith.constant dense<0xFF800000> : vector<16xf32>
    %40 = vector.multi_reduction <maximumf>, %39, %cst_19 [1] : vector<16x16xf32> to vector<16xf32>
    %41 = vector.shape_cast %40 : vector<16xf32> to vector<16x1xf32>
    %42 = vector.broadcast %41 : vector<16x1xf32> to vector<16x16xf32>
    %43 = arith.subf %39, %42 : vector<16x16xf32>
    %44 = math.exp %43 : vector<16x16xf32>
    %cst_20 = arith.constant dense<0.000000e+00> : vector<16xf32>
    %45 = vector.multi_reduction <add>, %44, %cst_20 [1] : vector<16x16xf32> to vector<16xf32>
    %46 = vector.shape_cast %45 : vector<16xf32> to vector<16x1xf32>
    %47 = tpu.reciprocal %46 {approx = true} : vector<16x1xf32> -> vector<16x1xf32>
    %48 = vector.broadcast %47 : vector<16x1xf32> to vector<16x16xf32>
    %49 = arith.mulf %44, %48 : vector<16x16xf32>
    %cst_21 = arith.constant dense<0.000000e+00> : vector<16x16xf32>
    %50 = tpu.matmul %49, %36, %cst_21 {dimension_numbers = #tpu.dot_dimension_numbers<[1], [0], [0], [1], [0, 0, 1, 1], [], []>} : vector<16x16xf32>, vector<16x16xf32>, vector<16x16xf32> -> vector<16x16xf32>
    %51 = tpu.concatenate %33, %50 in 1 : vector<16x16xf32>, vector<16x16xf32> -> vector<16x32xf32>
    %52 = vector.extract_strided_slice %7 {offsets = [0, 96], sizes = [32, 32], strides = [1, 1]} : vector<32x128xf32> to vector<32x32xf32>
    %cst_22 = arith.constant dense<0.000000e+00> : vector<16x32xf32>
    %53 = tpu.matmul %51, %52, %cst_22 {dimension_numbers = #tpu.dot_dimension_numbers<[1], [0], [0], [1], [0, 0, 1, 1], [], []>} : vector<16x32xf32>, vector<32x32xf32>, vector<16x32xf32> -> vector<16x32xf32>
    %54 = vector.extract_strided_slice %11 {offsets = [1, 0], sizes = [1, 32], strides = [1, 1]} : vector<8x96xf32> to vector<1x32xf32>
    %55 = vector.broadcast %54 : vector<1x32xf32> to vector<16x32xf32>
    %56 = arith.addf %53, %55 : vector<16x32xf32>
    %57 = arith.addf %3, %56 : vector<16x32xf32>
    %58 = vector.extract_strided_slice %11 {offsets = [2, 0], sizes = [1, 32], strides = [1, 1]} : vector<8x96xf32> to vector<1x32xf32>
    %59 = vector.extract_strided_slice %11 {offsets = [3, 0], sizes = [1, 32], strides = [1, 1]} : vector<8x96xf32> to vector<1x32xf32>
    %cst_23 = arith.constant dense<0.000000e+00> : vector<16xf32>
    %60 = vector.multi_reduction <add>, %57, %cst_23 [1] : vector<16x32xf32> to vector<16xf32>
    %61 = vector.shape_cast %60 : vector<16xf32> to vector<16x1xf32>
    %cst_24 = arith.constant 3.200000e+01 : f32
    %62 = vector.broadcast %cst_24 : f32 to vector<16x1xf32>
    %63 = arith.divf %61, %62 : vector<16x1xf32>
    %64 = vector.broadcast %63 : vector<16x1xf32> to vector<16x32xf32>
    %65 = arith.subf %57, %64 : vector<16x32xf32>
    %66 = arith.mulf %65, %65 : vector<16x32xf32>
    %cst_25 = arith.constant dense<0.000000e+00> : vector<16xf32>
    %67 = vector.multi_reduction <add>, %66, %cst_25 [1] : vector<16x32xf32> to vector<16xf32>
    %68 = vector.shape_cast %67 : vector<16xf32> to vector<16x1xf32>
    %cst_26 = arith.constant 3.200000e+01 : f32
    %69 = vector.broadcast %cst_26 : f32 to vector<16x1xf32>
    %70 = arith.divf %68, %69 : vector<16x1xf32>
    %71 = vector.broadcast %63 : vector<16x1xf32> to vector<16x32xf32>
    %72 = arith.subf %57, %71 : vector<16x32xf32>
    %cst_27 = arith.constant 9.99999996E-13 : f32
    %73 = vector.broadcast %cst_27 : f32 to vector<16x1xf32>
    %74 = arith.addf %70, %73 : vector<16x1xf32>
    %75 = math.rsqrt %74 : vector<16x1xf32>
    %76 = vector.broadcast %75 : vector<16x1xf32> to vector<16x32xf32>
    %77 = arith.mulf %72, %76 : vector<16x32xf32>
    %78 = vector.broadcast %58 : vector<1x32xf32> to vector<16x32xf32>
    %79 = arith.mulf %77, %78 : vector<16x32xf32>
    %80 = vector.broadcast %59 : vector<1x32xf32> to vector<16x32xf32>
    %81 = arith.addf %79, %80 : vector<16x32xf32>
    %82 = vector.extract_strided_slice %9 {offsets = [0, 0], sizes = [32, 64], strides = [1, 1]} : vector<64x96xf32> to vector<32x64xf32>
    %cst_28 = arith.constant dense<0.000000e+00> : vector<16x64xf32>
    %83 = tpu.matmul %81, %82, %cst_28 {dimension_numbers = #tpu.dot_dimension_numbers<[1], [0], [0], [1], [0, 0, 1, 1], [], []>} : vector<16x32xf32>, vector<32x64xf32>, vector<16x64xf32> -> vector<16x64xf32>
    %84 = vector.extract_strided_slice %11 {offsets = [4, 0], sizes = [1, 64], strides = [1, 1]} : vector<8x96xf32> to vector<1x64xf32>
    %85 = vector.broadcast %84 : vector<1x64xf32> to vector<16x64xf32>
    %86 = arith.addf %83, %85 : vector<16x64xf32>
    %cst_29 = arith.constant 5.000000e-01 : f32
    %87 = vector.broadcast %cst_29 : f32 to vector<16x64xf32>
    %88 = arith.mulf %87, %86 : vector<16x64xf32>
    %cst_30 = arith.constant 0.707106769 : f32
    %89 = vector.broadcast %cst_30 : f32 to vector<16x64xf32>
    %90 = arith.mulf %86, %89 : vector<16x64xf32>
    %cst_31 = arith.constant 0.000000e+00 : f32
    %91 = vector.broadcast %cst_31 : f32 to vector<16x64xf32>
    %92 = arith.cmpf oge, %90, %91 : vector<16x64xf32>
    %cst_32 = arith.constant 1.000000e+00 : f32
    %cst_33 = arith.constant -1.000000e+00 : f32
    %93 = vector.broadcast %cst_32 : f32 to vector<16x64xf32>
    %94 = vector.broadcast %cst_33 : f32 to vector<16x64xf32>
    %95 = arith.select %92, %93, %94 : vector<16x64xi1>, vector<16x64xf32>
    %96 = math.absf %90 : vector<16x64xf32>
    %cst_34 = arith.constant 0.327591091 : f32
    %97 = vector.broadcast %cst_34 : f32 to vector<16x64xf32>
    %98 = arith.mulf %97, %96 : vector<16x64xf32>
    %cst_35 = arith.constant 1.000000e+00 : f32
    %99 = vector.broadcast %cst_35 : f32 to vector<16x64xf32>
    %100 = arith.addf %99, %98 : vector<16x64xf32>
    %cst_36 = arith.constant 1.000000e+00 : f32
    %101 = vector.broadcast %cst_36 : f32 to vector<16x64xf32>
    %102 = arith.divf %101, %100 : vector<16x64xf32>
    %cst_37 = arith.constant 1.06140542 : f32
    %103 = vector.broadcast %cst_37 : f32 to vector<16x64xf32>
    %104 = arith.mulf %103, %102 : vector<16x64xf32>
    %cst_38 = arith.constant -1.45315206 : f32
    %105 = vector.broadcast %cst_38 : f32 to vector<16x64xf32>
    %106 = arith.addf %104, %105 : vector<16x64xf32>
    %107 = arith.mulf %106, %102 : vector<16x64xf32>
    %cst_39 = arith.constant 1.42141378 : f32
    %108 = vector.broadcast %cst_39 : f32 to vector<16x64xf32>
    %109 = arith.addf %107, %108 : vector<16x64xf32>
    %110 = arith.mulf %109, %102 : vector<16x64xf32>
    %cst_40 = arith.constant -0.284496725 : f32
    %111 = vector.broadcast %cst_40 : f32 to vector<16x64xf32>
    %112 = arith.addf %110, %111 : vector<16x64xf32>
    %113 = arith.mulf %112, %102 : vector<16x64xf32>
    %cst_41 = arith.constant 0.254829586 : f32
    %114 = vector.broadcast %cst_41 : f32 to vector<16x64xf32>
    %115 = arith.addf %113, %114 : vector<16x64xf32>
    %116 = arith.mulf %115, %102 : vector<16x64xf32>
    %cst_42 = arith.constant 0.000000e+00 : f32
    %117 = vector.broadcast %cst_42 : f32 to vector<16x64xf32>
    %118 = arith.subf %117, %96 : vector<16x64xf32>
    %119 = arith.mulf %118, %96 : vector<16x64xf32>
    %120 = math.exp %119 : vector<16x64xf32>
    %121 = arith.mulf %116, %120 : vector<16x64xf32>
    %cst_43 = arith.constant 1.000000e+00 : f32
    %122 = vector.broadcast %cst_43 : f32 to vector<16x64xf32>
    %123 = arith.subf %122, %121 : vector<16x64xf32>
    %124 = arith.mulf %95, %123 : vector<16x64xf32>
    %cst_44 = arith.constant 1.000000e+00 : f32
    %125 = vector.broadcast %cst_44 : f32 to vector<16x64xf32>
    %126 = arith.addf %125, %124 : vector<16x64xf32>
    %127 = arith.mulf %88, %126 : vector<16x64xf32>
    %128 = vector.extract_strided_slice %9 {offsets = [0, 64], sizes = [64, 32], strides = [1, 1]} : vector<64x96xf32> to vector<64x32xf32>
    %cst_45 = arith.constant dense<0.000000e+00> : vector<16x32xf32>
    %129 = tpu.matmul %127, %128, %cst_45 {dimension_numbers = #tpu.dot_dimension_numbers<[1], [0], [0], [1], [0, 0, 1, 1], [], []>} : vector<16x64xf32>, vector<64x32xf32>, vector<16x32xf32> -> vector<16x32xf32>
    %130 = vector.extract_strided_slice %11 {offsets = [5, 0], sizes = [1, 32], strides = [1, 1]} : vector<8x96xf32> to vector<1x32xf32>
    %131 = vector.broadcast %130 : vector<1x32xf32> to vector<16x32xf32>
    %132 = arith.addf %129, %131 : vector<16x32xf32>
    %133 = arith.addf %81, %132 : vector<16x32xf32>
    %134 = vector.extract_strided_slice %11 {offsets = [6, 0], sizes = [1, 32], strides = [1, 1]} : vector<8x96xf32> to vector<1x32xf32>
    %135 = vector.extract_strided_slice %11 {offsets = [7, 0], sizes = [1, 32], strides = [1, 1]} : vector<8x96xf32> to vector<1x32xf32>
    %cst_46 = arith.constant dense<0.000000e+00> : vector<16xf32>
    %136 = vector.multi_reduction <add>, %133, %cst_46 [1] : vector<16x32xf32> to vector<16xf32>
    %137 = vector.shape_cast %136 : vector<16xf32> to vector<16x1xf32>
    %cst_47 = arith.constant 3.200000e+01 : f32
    %138 = vector.broadcast %cst_47 : f32 to vector<16x1xf32>
    %139 = arith.divf %137, %138 : vector<16x1xf32>
    %140 = vector.broadcast %139 : vector<16x1xf32> to vector<16x32xf32>
    %141 = arith.subf %133, %140 : vector<16x32xf32>
    %142 = arith.mulf %141, %141 : vector<16x32xf32>
    %cst_48 = arith.constant dense<0.000000e+00> : vector<16xf32>
    %143 = vector.multi_reduction <add>, %142, %cst_48 [1] : vector<16x32xf32> to vector<16xf32>
    %144 = vector.shape_cast %143 : vector<16xf32> to vector<16x1xf32>
    %cst_49 = arith.constant 3.200000e+01 : f32
    %145 = vector.broadcast %cst_49 : f32 to vector<16x1xf32>
    %146 = arith.divf %144, %145 : vector<16x1xf32>
    %147 = vector.broadcast %139 : vector<16x1xf32> to vector<16x32xf32>
    %148 = arith.subf %133, %147 : vector<16x32xf32>
    %cst_50 = arith.constant 9.99999996E-13 : f32
    %149 = vector.broadcast %cst_50 : f32 to vector<16x1xf32>
    %150 = arith.addf %146, %149 : vector<16x1xf32>
    %151 = math.rsqrt %150 : vector<16x1xf32>
    %152 = vector.broadcast %151 : vector<16x1xf32> to vector<16x32xf32>
    %153 = arith.mulf %148, %152 : vector<16x32xf32>
    %154 = vector.broadcast %134 : vector<1x32xf32> to vector<16x32xf32>
    %155 = arith.mulf %153, %154 : vector<16x32xf32>
    %156 = vector.broadcast %135 : vector<1x32xf32> to vector<16x32xf32>
    %157 = arith.addf %155, %156 : vector<16x32xf32>
    %c0_51 = arith.constant 0 : index
    %c0_52 = arith.constant 0 : index
    %158 = vector.load %arg7[%c0_51, %c0_52] : memref<16x32xf32, #tpu.memory_space<vmem>>, vector<16x32xf32>
    tpu.vector_store %arg7[%c0_51, %c0_52], %157 {strides = array<i32>} : memref<16x32xf32, #tpu.memory_space<vmem>>, vector<16x32xf32>,
    return
  }
  func.func @transform_0(%arg0: i32, %arg1: i32) -> (i32, i32) {
    %c0_i32 = arith.constant 0 : i32
    %c0_i32_0 = arith.constant 0 : i32
    return %arg0, %c0_i32 : i32, i32
  }
  func.func @transform_1(%arg0: i32, %arg1: i32) -> (i32, i32, i32) {
    %c0_i32 = arith.constant 0 : i32
    %c0_i32_0 = arith.constant 0 : i32
    %c0_i32_1 = arith.constant 0 : i32
    return %arg0, %c0_i32, %c0_i32_0 : i32, i32, i32
  }
  func.func @transform_2(%arg0: i32, %arg1: i32) -> (i32, i32, i32) {
    %c0_i32 = arith.constant 0 : i32
    %c0_i32_0 = arith.constant 0 : i32
    %c0_i32_1 = arith.constant 0 : i32
    return %arg1, %c0_i32, %c0_i32_0 : i32, i32, i32
  }
  func.func @transform_3(%arg0: i32, %arg1: i32) -> (i32, i32, i32) {
    %c0_i32 = arith.constant 0 : i32
    %c0_i32_0 = arith.constant 0 : i32
    %c0_i32_1 = arith.constant 0 : i32
    return %arg1, %c0_i32, %c0_i32_0 : i32, i32, i32
  }
  func.func @transform_4(%arg0: i32, %arg1: i32) -> (i32, i32, i32) {
    %c0_i32 = arith.constant 0 : i32
    %c0_i32_0 = arith.constant 0 : i32
    %c0_i32_1 = arith.constant 0 : i32
    return %arg1, %c0_i32, %c0_i32_0 : i32, i32, i32
  }
  func.func @transform_5(%arg0: i32, %arg1: i32) -> (i32, i32) {
    %c0_i32 = arith.constant 0 : i32
    %c0_i32_0 = arith.constant 0 : i32
    return %arg0, %c0_i32 : i32, i32
  }
}

module attributes {stable_mosaic.version = 11 : i64} {
  func.func @_heads_kernel(%arg0: i32, %arg1: memref<32x32xf32, #tpu.memory_space<vmem>>, %arg2: memref<32x64xf32, #tpu.memory_space<vmem>>, %arg3: memref<1x64xf32, #tpu.memory_space<vmem>>, %arg4: memref<32x1xi32, #tpu.memory_space<vmem>>, %arg5: memref<64x4xf32, #tpu.memory_space<vmem>>, %arg6: memref<2x32xf32, #tpu.memory_space<vmem>>, %arg7: memref<8x32xf32, #tpu.memory_space<vmem>>, %arg8: memref<32x2xf32, #tpu.memory_space<vmem>>, %arg9: memref<1x2xf32, #tpu.memory_space<vmem>>, %arg10: memref<8x1xi32, #tpu.memory_space<vmem>>, %arg11: memref<1x1xf32, #tpu.memory_space<vmem>>, %arg12: memref<2x4xf32, #tpu.memory_space<vmem>>) attributes {dimension_semantics = [#tpu.dimension_semantics<arbitrary>], iteration_bounds = array<i64: 1>, scalar_prefetch = 0 : i64, scratch_operands = 0 : i64, tpu.core_type = #tpu.core_type<tc>, window_params = [{pipeline_mode = #tpu.pipeline_mode<synchronous>, transform_indices = @transform_0, window_bounds = array<i64: 32, 32>}, {pipeline_mode = #tpu.pipeline_mode<synchronous>, transform_indices = @transform_1, window_bounds = array<i64: 32, 64>}, {pipeline_mode = #tpu.pipeline_mode<synchronous>, transform_indices = @transform_2, window_bounds = array<i64: 1, 64>}, {pipeline_mode = #tpu.pipeline_mode<synchronous>, transform_indices = @transform_3, window_bounds = array<i64: 32, 1>}, {pipeline_mode = #tpu.pipeline_mode<synchronous>, transform_indices = @transform_4, window_bounds = array<i64: 64, 4>}, {pipeline_mode = #tpu.pipeline_mode<synchronous>, transform_indices = @transform_5, window_bounds = array<i64: 2, 32>}, {pipeline_mode = #tpu.pipeline_mode<synchronous>, transform_indices = @transform_6, window_bounds = array<i64: 8, 32>}, {pipeline_mode = #tpu.pipeline_mode<synchronous>, transform_indices = @transform_7, window_bounds = array<i64: 32, 2>}, {pipeline_mode = #tpu.pipeline_mode<synchronous>, transform_indices = @transform_8, window_bounds = array<i64: 1, 2>}, {pipeline_mode = #tpu.pipeline_mode<synchronous>, transform_indices = @transform_9, window_bounds = array<i64: 8, 1>}, {pipeline_mode = #tpu.pipeline_mode<synchronous>, transform_indices = @transform_10, window_bounds = array<i64: 1, 1>}, {pipeline_mode = #tpu.pipeline_mode<synchronous>, transform_indices = @transform_11, window_bounds = array<i64: 2, 4>}]} {
    %c0 = arith.constant 0 : index
    %c0_0 = arith.constant 0 : index
    %0 = vector.load %arg1[%c0, %c0_0] : memref<32x32xf32, #tpu.memory_space<vmem>>, vector<32x32xf32>
    %c0_1 = arith.constant 0 : index
    %c0_2 = arith.constant 0 : index
    %1 = vector.load %arg2[%c0_1, %c0_2] : memref<32x64xf32, #tpu.memory_space<vmem>>, vector<32x64xf32>
    %cst = arith.constant dense<0.000000e+00> : vector<32x64xf32>
    %2 = tpu.matmul %0, %1, %cst {dimension_numbers = #tpu.dot_dimension_numbers<[1], [0], [0], [1], [0, 0, 1, 1], [], []>} : vector<32x32xf32>, vector<32x64xf32>, vector<32x64xf32> -> vector<32x64xf32>
    %c0_3 = arith.constant 0 : index
    %c0_4 = arith.constant 0 : index
    %3 = vector.load %arg3[%c0_3, %c0_4] : memref<1x64xf32, #tpu.memory_space<vmem>>, vector<1x64xf32>
    %4 = vector.broadcast %3 : vector<1x64xf32> to vector<32x64xf32>
    %5 = arith.addf %2, %4 : vector<32x64xf32>
    %c0_5 = arith.constant 0 : index
    %c0_6 = arith.constant 0 : index
    %6 = vector.load %arg4[%c0_5, %c0_6] : memref<32x1xi32, #tpu.memory_space<vmem>>, vector<32x1xi32>
    %cst_7 = arith.constant dense<0xFF800000> : vector<32xf32>
    %7 = vector.multi_reduction <maximumf>, %5, %cst_7 [1] : vector<32x64xf32> to vector<32xf32>
    %8 = vector.shape_cast %7 : vector<32xf32> to vector<32x1xf32>
    %9 = vector.broadcast %8 : vector<32x1xf32> to vector<32x64xf32>
    %10 = arith.subf %5, %9 : vector<32x64xf32>
    %11 = math.exp %10 : vector<32x64xf32>
    %cst_8 = arith.constant dense<0.000000e+00> : vector<32xf32>
    %12 = vector.multi_reduction <add>, %11, %cst_8 [1] : vector<32x64xf32> to vector<32xf32>
    %13 = vector.shape_cast %12 : vector<32xf32> to vector<32x1xf32>
    %14 = math.log %13 : vector<32x1xf32>
    %15 = arith.addf %8, %14 : vector<32x1xf32>
    %16 = tpu.iota {dimensions = array<i32: 1>} : vector<32x64xi32>
    %17 = vector.broadcast %6 : vector<32x1xi32> to vector<32x64xi32>
    %18 = arith.cmpi eq, %16, %17 : vector<32x64xi32>
    %cst_9 = arith.constant 0.000000e+00 : f32
    %19 = vector.broadcast %cst_9 : f32 to vector<32x64xf32>
    %20 = arith.select %18, %5, %19 : vector<32x64xi1>, vector<32x64xf32>
    %cst_10 = arith.constant dense<0.000000e+00> : vector<32xf32>
    %21 = vector.multi_reduction <add>, %20, %cst_10 [1] : vector<32x64xf32> to vector<32xf32>
    %22 = vector.shape_cast %21 : vector<32xf32> to vector<32x1xf32>
    %23 = arith.subf %15, %22 : vector<32x1xf32>
    %cst_11 = arith.constant dense<0.000000e+00> : vector<1xf32>
    %24 = vector.multi_reduction <add>, %23, %cst_11 [0] : vector<32x1xf32> to vector<1xf32>
    %25 = vector.shape_cast %24 : vector<1xf32> to vector<1x1xf32>
    %cst_12 = arith.constant 3.125000e-02 : f32
    %26 = vector.broadcast %cst_12 : f32 to vector<1x1xf32>
    %27 = arith.mulf %25, %26 : vector<1x1xf32>
    %c0_13 = arith.constant 0 : index
    %c0_14 = arith.constant 0 : index
    %28 = vector.load %arg5[%c0_13, %c0_14] : memref<64x4xf32, #tpu.memory_space<vmem>>, vector<64x4xf32>
    %cst_15 = arith.constant dense<0.000000e+00> : vector<32x4xf32>
    %29 = tpu.matmul %5, %28, %cst_15 {dimension_numbers = #tpu.dot_dimension_numbers<[1], [0], [0], [1], [0, 0, 1, 1], [], []>} : vector<32x64xf32>, vector<64x4xf32>, vector<32x4xf32> -> vector<32x4xf32>
    %c0_16 = arith.constant 0 : index
    %c0_17 = arith.constant 0 : index
    %30 = vector.load %arg6[%c0_16, %c0_17] : memref<2x32xf32, #tpu.memory_space<vmem>>, vector<2x32xf32>
    %cst_18 = arith.constant dense<0.000000e+00> : vector<2x4xf32>
    %31 = tpu.matmul %30, %29, %cst_18 {dimension_numbers = #tpu.dot_dimension_numbers<[1], [0], [0], [1], [0, 0, 1, 1], [], []>} : vector<2x32xf32>, vector<32x4xf32>, vector<2x4xf32> -> vector<2x4xf32>
    %c0_19 = arith.constant 0 : index
    %c0_20 = arith.constant 0 : index
    %32 = vector.load %arg12[%c0_19, %c0_20] : memref<2x4xf32, #tpu.memory_space<vmem>>, vector<2x4xf32>
    tpu.vector_store %arg12[%c0_19, %c0_20], %31 {strides = array<i32>} : memref<2x4xf32, #tpu.memory_space<vmem>>, vector<2x4xf32>,
    %c0_21 = arith.constant 0 : index
    %c0_22 = arith.constant 0 : index
    %33 = vector.load %arg7[%c0_21, %c0_22] : memref<8x32xf32, #tpu.memory_space<vmem>>, vector<8x32xf32>
    %cst_23 = arith.constant dense<0.000000e+00> : vector<8x32xf32>
    %34 = tpu.matmul %33, %0, %cst_23 {dimension_numbers = #tpu.dot_dimension_numbers<[1], [0], [0], [1], [0, 0, 1, 1], [], []>} : vector<8x32xf32>, vector<32x32xf32>, vector<8x32xf32> -> vector<8x32xf32>
    %c0_24 = arith.constant 0 : index
    %c0_25 = arith.constant 0 : index
    %35 = vector.load %arg8[%c0_24, %c0_25] : memref<32x2xf32, #tpu.memory_space<vmem>>, vector<32x2xf32>
    %cst_26 = arith.constant dense<0.000000e+00> : vector<8x2xf32>
    %36 = tpu.matmul %34, %35, %cst_26 {dimension_numbers = #tpu.dot_dimension_numbers<[1], [0], [0], [1], [0, 0, 1, 1], [], []>} : vector<8x32xf32>, vector<32x2xf32>, vector<8x2xf32> -> vector<8x2xf32>
    %c0_27 = arith.constant 0 : index
    %c0_28 = arith.constant 0 : index
    %37 = vector.load %arg9[%c0_27, %c0_28] : memref<1x2xf32, #tpu.memory_space<vmem>>, vector<1x2xf32>
    %38 = vector.broadcast %37 : vector<1x2xf32> to vector<8x2xf32>
    %39 = arith.addf %36, %38 : vector<8x2xf32>
    %c0_29 = arith.constant 0 : index
    %c0_30 = arith.constant 0 : index
    %40 = vector.load %arg10[%c0_29, %c0_30] : memref<8x1xi32, #tpu.memory_space<vmem>>, vector<8x1xi32>
    %cst_31 = arith.constant dense<0xFF800000> : vector<8xf32>
    %41 = vector.multi_reduction <maximumf>, %39, %cst_31 [1] : vector<8x2xf32> to vector<8xf32>
    %42 = vector.shape_cast %41 : vector<8xf32> to vector<8x1xf32>
    %43 = vector.broadcast %42 : vector<8x1xf32> to vector<8x2xf32>
    %44 = arith.subf %39, %43 : vector<8x2xf32>
    %45 = math.exp %44 : vector<8x2xf32>
    %cst_32 = arith.constant dense<0.000000e+00> : vector<8xf32>
    %46 = vector.multi_reduction <add>, %45, %cst_32 [1] : vector<8x2xf32> to vector<8xf32>
    %47 = vector.shape_cast %46 : vector<8xf32> to vector<8x1xf32>
    %48 = math.log %47 : vector<8x1xf32>
    %49 = arith.addf %42, %48 : vector<8x1xf32>
    %50 = tpu.iota {dimensions = array<i32: 1>} : vector<8x2xi32>
    %51 = vector.broadcast %40 : vector<8x1xi32> to vector<8x2xi32>
    %52 = arith.cmpi eq, %50, %51 : vector<8x2xi32>
    %cst_33 = arith.constant 0.000000e+00 : f32
    %53 = vector.broadcast %cst_33 : f32 to vector<8x2xf32>
    %54 = arith.select %52, %39, %53 : vector<8x2xi1>, vector<8x2xf32>
    %cst_34 = arith.constant dense<0.000000e+00> : vector<8xf32>
    %55 = vector.multi_reduction <add>, %54, %cst_34 [1] : vector<8x2xf32> to vector<8xf32>
    %56 = vector.shape_cast %55 : vector<8xf32> to vector<8x1xf32>
    %57 = arith.subf %49, %56 : vector<8x1xf32>
    %cst_35 = arith.constant dense<0.000000e+00> : vector<1xf32>
    %58 = vector.multi_reduction <add>, %57, %cst_35 [0] : vector<8x1xf32> to vector<1xf32>
    %59 = vector.shape_cast %58 : vector<1xf32> to vector<1x1xf32>
    %cst_36 = arith.constant 1.250000e-01 : f32
    %60 = vector.broadcast %cst_36 : f32 to vector<1x1xf32>
    %61 = arith.mulf %59, %60 : vector<1x1xf32>
    %62 = arith.addf %27, %61 : vector<1x1xf32>
    %c0_37 = arith.constant 0 : index
    %c0_38 = arith.constant 0 : index
    %63 = vector.load %arg11[%c0_37, %c0_38] : memref<1x1xf32, #tpu.memory_space<vmem>>, vector<1x1xf32>
    tpu.vector_store %arg11[%c0_37, %c0_38], %62 {strides = array<i32>} : memref<1x1xf32, #tpu.memory_space<vmem>>, vector<1x1xf32>,
    return
  }
  func.func @transform_0(%arg0: i32) -> (i32, i32) {
    %c0_i32 = arith.constant 0 : i32
    %c0_i32_0 = arith.constant 0 : i32
    %c0_i32_1 = arith.constant 0 : i32
    return %c0_i32, %c0_i32_0 : i32, i32
  }
  func.func @transform_1(%arg0: i32) -> (i32, i32) {
    %c0_i32 = arith.constant 0 : i32
    %c0_i32_0 = arith.constant 0 : i32
    %c0_i32_1 = arith.constant 0 : i32
    return %c0_i32, %c0_i32_0 : i32, i32
  }
  func.func @transform_2(%arg0: i32) -> (i32, i32) {
    %c0_i32 = arith.constant 0 : i32
    %c0_i32_0 = arith.constant 0 : i32
    %c0_i32_1 = arith.constant 0 : i32
    return %c0_i32, %c0_i32_0 : i32, i32
  }
  func.func @transform_3(%arg0: i32) -> (i32, i32) {
    %c0_i32 = arith.constant 0 : i32
    %c0_i32_0 = arith.constant 0 : i32
    %c0_i32_1 = arith.constant 0 : i32
    return %c0_i32, %c0_i32_0 : i32, i32
  }
  func.func @transform_4(%arg0: i32) -> (i32, i32) {
    %c0_i32 = arith.constant 0 : i32
    %c0_i32_0 = arith.constant 0 : i32
    %c0_i32_1 = arith.constant 0 : i32
    return %c0_i32, %c0_i32_0 : i32, i32
  }
  func.func @transform_5(%arg0: i32) -> (i32, i32) {
    %c0_i32 = arith.constant 0 : i32
    %c0_i32_0 = arith.constant 0 : i32
    %c0_i32_1 = arith.constant 0 : i32
    return %c0_i32, %c0_i32_0 : i32, i32
  }
  func.func @transform_6(%arg0: i32) -> (i32, i32) {
    %c0_i32 = arith.constant 0 : i32
    %c0_i32_0 = arith.constant 0 : i32
    %c0_i32_1 = arith.constant 0 : i32
    return %c0_i32, %c0_i32_0 : i32, i32
  }
  func.func @transform_7(%arg0: i32) -> (i32, i32) {
    %c0_i32 = arith.constant 0 : i32
    %c0_i32_0 = arith.constant 0 : i32
    %c0_i32_1 = arith.constant 0 : i32
    return %c0_i32, %c0_i32_0 : i32, i32
  }
  func.func @transform_8(%arg0: i32) -> (i32, i32) {
    %c0_i32 = arith.constant 0 : i32
    %c0_i32_0 = arith.constant 0 : i32
    %c0_i32_1 = arith.constant 0 : i32
    return %c0_i32, %c0_i32_0 : i32, i32
  }
  func.func @transform_9(%arg0: i32) -> (i32, i32) {
    %c0_i32 = arith.constant 0 : i32
    %c0_i32_0 = arith.constant 0 : i32
    %c0_i32_1 = arith.constant 0 : i32
    return %c0_i32, %c0_i32_0 : i32, i32
  }
  func.func @transform_10(%arg0: i32) -> (i32, i32) {
    %c0_i32 = arith.constant 0 : i32
    %c0_i32_0 = arith.constant 0 : i32
    %c0_i32_1 = arith.constant 0 : i32
    return %c0_i32, %c0_i32_0 : i32, i32
  }
  func.func @transform_11(%arg0: i32) -> (i32, i32) {
    %c0_i32 = arith.constant 0 : i32
    %c0_i32_0 = arith.constant 0 : i32
    %c0_i32_1 = arith.constant 0 : i32
    return %c0_i32, %c0_i32_0 : i32, i32
  }
}

</mosaic_0001>

<bundles_post_ra>
// kernel: ed_bert_forward.2
= control target key start
LH: loop header
LB: loop body
LE: loop exit
PB: predicated region body
PF: predicated region fallthrough
CT: control target
= control target key end

     0   :  { %s1823_s18 = smov 0   ;;  %s1825_s19 = smov 0   ;;  %s2019_s0 = inlined_call_operand.vmem [shape: f32[32,32], index: 0, kind: input, shape index: {}]   ;;  %s2020_s1 = inlined_call_operand.vmem [shape: f32[2,1,16], index: 1, kind: input, shape index: {}]   ;;  %s2021_s2 = inlined_call_operand.vmem [shape: f32[2,32,128], index: 2, kind: input, shape index: {}]   ;;  %s2022_s3 = inlined_call_operand.vmem [shape: f32[2,64,96], index: 3, kind: input, shape index: {}]   ;;  %s2023_s4 = inlined_call_operand.vmem [shape: f32[2,8,96], index: 4, kind: input, shape index: {}]   ;;  %s2024_s5 = inlined_call_operand.vmem [shape: f32[32,32], index: 5, kind: output, shape index: {}]  }
   0x1   :  { %s1827_s20 = smov 0   ;;  %s1829_s21 = smov 0  }
   0x2   :  { %s1831_s22 = smov 0  }
   0x3 LB: > { %s24_s23 = sadd.s32 1, %s1775_s20  ;;  %s27_s24 = sadd.s32 1, %s1779_s21  ;;  %s1783_s22 = sphi %s1831_s22, %s15_s22   ;;  %s1779_s21 = sphi %s1829_s21, %s2029_s21   ;;  %s1775_s20 = sphi %s1827_s20, %s2028_s20   ;;  %s1771_s19 = sphi %s1825_s19, %s2027_s19   ;;  %s1767_s18 = sphi %s1823_s18, %s2026_s18  }
   0x4   : > { %p25_p0 = scmp.ge.s32.totalorder %s24_s23, 2  ;;  %p1395_p1 = scmp.ge.s32.totalorder %s1783_s22, 1 }
   0x5   : > { %p237_p2 = scmp.lt.s32.totalorder %s1783_s22, 5 }
   0x6   : > { %s2031_s23 = smov (%p25_p0, %s24_s23), 0  ;;  %s2033_s24 = smov (!%p25_p0, %s27_s24), %s1779_s21 }
   0x7   : > { %p238_p3 = pnand %p1395_p1, %p237_p2  ;;  %p29_p4 = scmp.ge.s32.totalorder %s2033_s24, 2 }
   0x8   : > { %s1396_s25 = sshll.u32 (!%p238_p3), %s1771_s19, 1  ;;  %p288_p5 = scmp.lt.s32.totalorder (!%p238_p3), %s1771_s19, 1 }
   0x9   : > { %s2035_s24 = smov (%p29_p4, %s2033_s24), 0  ;;  %241 = sbr.rel (%p238_p3) target bundleno = 2585 (0xa19), region = 40 }
   0xa   : > { %p283_p6 = scmp.lt.s32.totalorder (!%p238_p3), %s1396_s25, 3  ;;  %p291_p7 = scmp.lt.s32.totalorder (!%p238_p3), %s1767_s18, 1 }
   0xb   : > { %p1405_p8 = scmp.ne.s32.totalorder (!%p238_p3), %s1767_s18, 0 }
  0x10   : > { %s2037_s19 = smov (!%p288_p5, %s1771_s19), 1  ;;  %s2039_s25 = smov (!%p283_p6, %s1396_s25), 3 }
  0x11   : > { %s1397_s29 = sshll.u32 %s2039_s25, 3  ;;  %vm317_vm0 = vcmask (!%p1405_p8), 261120  }
  0x12   : > { %s286_s7 = scalar_lea.vmem %s2019_s0, %s1397_s29  ;;  %s1868_s10 = scalar_lea.vmem %s2024_s5, %s1397_s29 }
  0x13   : > { %s292_s11 = scalar_select %p291_p7, %s1767_s18, 1 }
  0x14   : > { %314 = sbr.rel (%p1405_p8) target bundleno = 27 (0x1b), region = 44  ;;  %v315_v0 = vld [vmem:[%s286_s7] sm:$0xff] (!%p1405_p8)  ;;  %v316_v1 = vld [vmem:[%s286_s7 + $0x8] sm:$0xff] (!%p1405_p8) }
  0x15   : > { %s1429_s12 = sshll.u32 %s292_s11, 5  ;;  %s1430_s13 = sshll.u32 %s292_s11, 6  ;;  %318 = vst.msk [vmem:[%s1868_s10] sm:$0xff] (!%p1405_p8), %vm317_vm0, %v315_v0  ;;  %319 = vst.msk [vmem:[%s1868_s10 + $0x8] sm:$0xff] (!%p1405_p8), %vm317_vm0, %v316_v1 }
  0x16   : > { %s295_s16 = scalar_lea.vmem %s2021_s2, %s1429_s12  ;;  %s1877_s25 = scalar_lea.vmem %s2022_s3, %s1430_s13 }
  0x17   : > { %s1402_s27 = sshll.u32 %s292_s11, 3 }
  0x18   : > { %s304_s28 = scalar_lea.vmem %s2023_s4, %s1402_s27 }
  0x1b PF: > { %v1885_v2 = vld [vmem:[%s295_s16] sm:$0xff]  ;;  %v1887_v3 = vld [vmem:[%s295_s16 + $0x8] sm:$0xff]  ;;  %v1889_v4 = vld [vmem:[%s295_s16 + $0x10] sm:$0xff]  ;;  %vm340_vm1 = vcmask 261120   ;;  %v336_v11 = vlaneseq  ;;  %vm434_vm2 = vcmask 130048   ;;  %s1785_s18 = smov 112   ;;  %s2025_s9 = scalar_lea.vmem %s2020_s1, %s2037_s19 }
  0x1c   : > { %v1683_v5 = vpack.i.bf16 %v1887_v3, %v1885_v2  ;;  %v1555_v6 = vpack.c.bf16 %v1887_v3, %v1885_v2  ;;  %v1895_v7 = vld [vmem:[%s295_s16 + $0x18] sm:$0xff]  ;;  %v1898_v8 = vld [vmem:[%s1868_s10] sm:$0xff]  ;;  %v1905_v10 = vld [vmem:[%s1868_s10 + $0x8] sm:$0xff]  ;;  %s1786_s29 = smov 96   ;;  %s1787_s7 = smov 80   ;;  %vm1154_vm6 = vcmask 523264  }
  0x1d   : > { %v1559_v9 = vpack.c.bf16 %v1895_v7, %v1889_v4  ;;  %1483 = vmatprep.mubr.msk.f32.mxu1 %vm340_vm1, %v1898_v8  ;;  %v1909_v12 = vshrl.u32 %v336_v11, 7  ;;  %v1912_v14 = vld [vmem:[%s304_s28] sm:$0xff]  ;;  %vm1564_vm3 = vmpackc.low %vm434_vm2, %vm434_vm2  ;;  %s1788_s19 = smov 64   ;;  %s1789_s11 = smov 48   ;;  %v1688_v0 = vpack.i.bf16 %v1895_v7, %v1889_v4 }
  0x1e   : > { %1556 = vmatprep.subr.bf16.mxu1 %v1555_v6  ;;  %v1408_v31 = vld [vmem:[%s2025_s9] ss:$0 sm:$0xff]  ;;  %s1790_s12 = smov 32   ;;  %s1791_s13 = smov 16  }
  0x1f   : > { %1558 = vmatpush3.bf16.msra.mxu1 %v1555_v6  ;;  %v338_v13 = vsub.s32 0, %v1909_v12 }
  0x20   : > { %1560 = vmatprep.subr.bf16.mxu1 %v1559_v9 }
  0x21   : > { %v339_v15 = vrot.slane %v1912_v14, %v338_v13 }
  0x23   : > { %1562 = vmatpush3.bf16.msra.mxu1 %v1559_v9 }
  0x26   : > { %1484 = vmatmul.mubr.msk.f32.vlgmr.msra.gmra.mrb[0].mxu1 %vm340_vm1, %v1905_v10 }
  0xf9   : > { %v1485_v16 = vpop.f32.mrb[0].mxu1 }
  0xfa   : > { %v419_v17 = vadd.f32 %v1485_v16, %v339_v15  ;;  %v413_v18 = vpop.f32.mrb[1].mxu1 }
  0xfb   : > { %v414_v19 = vadd.f32 %v413_v18, %v339_v15 }
  0xfd   : > { %627 = vrot.lane.b32.xlu1 %v414_v19, %s1785_s18  ;;  %1490 = vmatprep.mubr.msk.f32.mxu1 %vm434_vm2, %v414_v19  ;;  %v1916_v20 = vpack.i.bf16 %v419_v17, %v414_v19 }
  0xff   : > { %1664 = vrot.lane.b32.xlu0 %v1916_v20, %s1786_s29 }
 0x101   : > { %629 = vrot.lane.b32.xlu1 %v419_v17, %s1785_s18 }
 0x103   : > { %1669 = vrot.lane.b32.xlu0 %v1916_v20, %s1787_s7 }
 0x16f   : > { %v628_v29 = vpop.permute.xlu1 %627 }
 0x171   : > { %v1665_v21 = vpop.permute.xlu0 %1664 }
 0x172   : > { %v1667_v22 = vunpack.i.h.bf16 %v1665_v21  ;;  %v1666_v23 = vunpack.i.l.bf16 %v1665_v21 }
 0x173   : > { %v630_v30 = vpop.permute.xlu1 %629 }
 0x174   : > { %v1563_v24 = vpack.c.bf16 %v1667_v22, %v1666_v23 }
 0x175   : > { %v1670_v25 = vpop.permute.xlu0 %1669 }
 0x176   : > { %v1672_v26 = vunpack.i.h.bf16 %v1670_v25  ;;  %v1671_v27 = vunpack.i.l.bf16 %v1670_v25  ;;  %1565 = vmatprep.subr.msk.bf16.mxu1 %vm1564_vm3, %v1563_v24 }
 0x177   : > { %1568 = vmatpush3.bf16.xpose.msk.msra.mxu1 %vm1564_vm3, %v1563_v24 }
 0x178   : > { %v1573_v28 = vpack.c.bf16 %v1672_v26, %v1671_v27 }
 0x17a   : > { %1575 = vmatprep.subr.msk.bf16.mxu1 %vm1564_vm3, %v1573_v28 }
 0x17e   : > { %1491 = vmatmul.mubr.msk.f32.vlgmr.msra.gmra.mrb[2].mxu1 %vm434_vm2, %v419_v17 }
 0x17f   : > { %1578 = vmatpush3.bf16.xpose.msk.msra.mxu1 %vm1564_vm3, %v1573_v28  ;;  %1504 = vmatprep.mubr.msk.f32.mxu1 %vm434_vm2, %v628_v29 }
 0x186   : > { %1505 = vmatmul.mubr.msk.f32.vlgmr.msra.gmra.mrb[4].mxu1 %vm434_vm2, %v630_v30 }
 0x251   : > { %v1492_v32 = vpop.f32.mrb[2].mxu1 }
 0x252   : > { %v515_v33 = vadd.f32 %v1492_v32, %v1408_v31  ;;  %v509_v34 = vpop.f32.mrb[3].mxu1 }
 0x253   : > { %v510_v35 = vadd.f32 %v1408_v31, %v509_v34 }
 0x254   : > { %v521_v36 = vsel %vm434_vm2, %v515_v33, -inf }
 0x255   : > { %522 = vmax.xlane.f32.xlu1 %v521_v36  ;;  %v518_v37 = vsel %vm434_vm2, %v510_v35, -inf }
 0x256   : > { %519 = vmax.xlane.f32.xlu0 %v518_v37 }
 0x259   : > { %v1506_v38 = vpop.f32.mrb[4].mxu1 }
 0x25a   : > { %v709_v39 = vpop.f32.mrb[5].mxu1  ;;  %v715_v41 = vadd.f32 %v1506_v38, %v1408_v31 }
 0x25b   : > { %v710_v40 = vadd.f32 %v1408_v31, %v709_v39 }
 0x25c   : > { %v721_v43 = vsel %vm434_vm2, %v715_v41, -inf }
 0x25d   : > { %v718_v42 = vsel %vm434_vm2, %v710_v40, -inf }
 0x25e   : > { %719 = vmax.xlane.f32.xlu0 %v718_v42 }
 0x262   : > { %722 = vmax.xlane.f32.xlu0 %v721_v43 }
 0x2e2   : > { %v523_v44 = vpop.xlane.xlu1 %522 }
 0x2e3   : > { %v525_v45 = vsub.f32 %v515_v33, %v523_v44  ;;  %v520_v46 = vpop.xlane.xlu0 %519 }
 0x2e4   : > { %v524_v47 = vsub.f32 %v510_v35, %v520_v46 }
 0x2e5   : > { %v528_v48 = vmul.f32 1.442695, %v525_v45 }
 0x2e6   : > { %v526_v49 = vmul.f32 1.442695, %v524_v47 }
 0x2e7   : > { %1713 = vpow2.f32 %v528_v48 }
 0x2e8   : > { %1715 = vpow2.f32 %v526_v49 }
 0x2eb   : > { %v720_v50 = vpop.xlane.xlu0 %719 }
 0x2ec   : > { %v724_v51 = vsub.f32 %v710_v40, %v720_v50 }
 0x2ee   : > { %v726_v52 = vmul.f32 1.442695, %v724_v51 }
 0x2ef   : > { %v723_v53 = vpop.xlane.xlu0 %722 }
 0x2f0   : > { %1717 = vpow2.f32 %v726_v52  ;;  %v725_v54 = vsub.f32 %v715_v41, %v723_v53  ;;  %v839_v41 = vsub.s32 1, %v1909_v12 }
 0x2f1   : > { %v1714_v55 = vpop.eup %1713 }
 0x2f2   : > { %v1716_v56 = vpop.eup %1715  ;;  %v728_v57 = vmul.f32 1.442695, %v725_v54  ;;  %v533_v58 = vsel %vm434_vm2, %v1714_v55, 0.0  ;;  %v840_v42 = vrot.slane %v1912_v14, %v839_v41 }
 0x2f3   : > { %534 = vadd.xlane.f32.xlu0 %v533_v58  ;;  %v530_v59 = vsel %vm434_vm2, %v1716_v56, 0.0 }
 0x2f4   : > { %1719 = vpow2.f32 %v728_v57  ;;  %531 = vadd.xlane.f32.xlu1 %v530_v59  ;;  %v327_v59 = vld [vmem:[%s1877_s25] sm:$0xff] }
 0x2fa   : > { %v1718_v60 = vpop.eup %1717 }
 0x2fb   : > { %v730_v61 = vsel %vm434_vm2, %v1718_v60, 0.0 }
 0x2fc   : > { %731 = vadd.xlane.f32.xlu1 %v730_v61 }
 0x2fe   : > { %v1720_v62 = vpop.eup %1719 }
 0x2ff   : > { %v733_v63 = vsel %vm434_vm2, %v1720_v62, 0.0 }
 0x300   : > { %734 = vadd.xlane.f32.xlu0 %v733_v63  ;;  %v330_v63 = vld [vmem:[%s1877_s25 + $0x18] sm:$0xff] }
 0x30d   : > { %1674 = vrot.lane.b32.xlu1 %v1916_v20, %s1788_s19 }
 0x311   : > { %1684 = vrot.lane.b32.xlu1 %v1683_v5, %s1790_s12 }
 0x315   : > { %1689 = vrot.lane.b32.xlu1 %v1688_v0, %s1790_s12 }
 0x316   : > { %1679 = vrot.lane.b32.xlu0 %v1916_v20, %s1789_s11 }
 0x380   : > { %v535_v6 = vpop.xlane.xlu0 %534 }
 0x381   : > { %v532_v1 = vpop.xlane.xlu1 %531 }
 0x382   : > { %1721 = vrcp.f32 %v532_v1 }
 0x383   : > { %1723 = vrcp.f32 %v535_v6 }
 0x389   : > { %v732_v9 = vpop.xlane.xlu1 %731 }
 0x38a   : > { %1725 = vrcp.f32 %v732_v9  ;;  %v331_v9 = vld [vmem:[%s1877_s25 + $0x20] sm:$0xff] }
 0x38c   : > { %v1722_v11 = vpop.eup %1721 }
 0x38d   : > { %v1675_v13 = vpop.permute.xlu1 %1674  ;;  %v735_v15 = vpop.xlane.xlu0 %734  ;;  %v538_v16 = vmul.f32 %v1722_v11, %v1716_v56  ;;  %v332_v11 = vld [vmem:[%s1877_s25 + $0x28] sm:$0xff] }
 0x38e   : > { %v1677_v17 = vunpack.i.h.bf16 %v1675_v13  ;;  %v1676_v18 = vunpack.i.l.bf16 %v1675_v13  ;;  %1727 = vrcp.f32 %v735_v15  ;;  %v1724_v3 = vpop.eup %1723  ;;  %v1703_v13 = vpack.i.bf16 %v332_v11, %v331_v9  ;;  %v333_v15 = vld [vmem:[%s1877_s25 + $0x30] sm:$0xff] }
 0x38f   : > { %1497 = vmatprep.mubr.msk.f32.mxu0 %vm434_vm2, %v538_v16  ;;  %v539_v21 = vmul.f32 %v1724_v3, %v1714_v55  ;;  %v334_v16 = vld [vmem:[%s1877_s25 + $0x38] sm:$0xff] }
 0x390   : > { %v1569_v2 = vpack.c.bf16 %v1677_v17, %v1676_v18  ;;  %v1708_v17 = vpack.i.bf16 %v334_v16, %v333_v15 }
 0x391   : > { %v1680_v5 = vpop.permute.xlu0 %1679  ;;  %v1685_v25 = vpop.permute.xlu1 %1684 }
 0x392   : > { %v1682_v4 = vunpack.i.h.bf16 %v1680_v5  ;;  %v1681_v7 = vunpack.i.l.bf16 %v1680_v5  ;;  %1570 = vmatprep.subr.bf16.mxu0 %v1569_v2  ;;  %v1687_v26 = vunpack.i.h.bf16 %v1685_v25  ;;  %v1686_v27 = vunpack.i.l.bf16 %v1685_v25 }
 0x393   : > { %1572 = vmatpush3.bf16.msra.mxu0 %v1569_v2 }
 0x394   : > { %v1726_v19 = vpop.eup %1725  ;;  %v1579_v20 = vpack.c.bf16 %v1682_v4, %v1681_v7  ;;  %v1583_v28 = vpack.c.bf16 %v1687_v26, %v1686_v27 }
 0x395   : > { %v738_v22 = vmul.f32 %v1726_v19, %v1718_v60  ;;  %v1690_v29 = vpop.permute.xlu1 %1689  ;;  %v328_v60 = vld [vmem:[%s1877_s25 + $0x8] sm:$0xff]  ;;  %v969_v19 = vsub.s32 2, %v1909_v12 }
 0x396   : > { %1498 = vmatmul.mubr.msk.f32.vlgmr.msra.gmra.mrb[0].mxu0 %vm434_vm2, %v539_v21  ;;  %1580 = vmatprep.subr.bf16.mxu0 %v1579_v20  ;;  %v1692_v30 = vunpack.i.h.bf16 %v1690_v29  ;;  %v1691_v31 = vunpack.i.l.bf16 %v1690_v29  ;;  %v1591_v61 = vpack.c.bf16 %v328_v60, %v327_v59  ;;  %v1693_v1 = vpack.i.bf16 %v328_v60, %v327_v59 }
 0x397   : > { %1582 = vmatpush3.bf16.msra.mxu0 %v1579_v20  ;;  %1511 = vmatprep.mubr.msk.f32.mxu0 %vm434_vm2, %v738_v22  ;;  %v975_v20 = vsub.s32 3, %v1909_v12  ;;  %v970_v21 = vrot.slane %v1912_v14, %v969_v19 }
 0x398   : > { %v1728_v23 = vpop.eup %1727  ;;  %1584 = vmatprep.subr.bf16.mxu0 %v1583_v28  ;;  %v1587_v32 = vpack.c.bf16 %v1692_v30, %v1691_v31  ;;  %1592 = vmatprep.subr.bf16.mxu1 %v1591_v61 }
 0x399   : > { %v739_v24 = vmul.f32 %v1728_v23, %v1720_v62  ;;  %1594 = vmatpush3.bf16.msra.mxu1 %v1591_v61  ;;  %v329_v62 = vld [vmem:[%s1877_s25 + $0x10] sm:$0xff] }
 0x39a   : > { %v1595_v0 = vpack.c.bf16 %v330_v63, %v329_v62  ;;  %v1698_v6 = vpack.i.bf16 %v330_v63, %v329_v62 }
 0x39b   : > { %1512 = vmatmul.mubr.msk.f32.vlgmr.msra.gmra.mrb[2].mxu0 %vm434_vm2, %v739_v24  ;;  %v976_v24 = vrot.slane %v1912_v14, %v975_v20 }
 0x39c   : > { %1586 = vmatpush3.bf16.msra.mxu0 %v1583_v28  ;;  %1596 = vmatprep.subr.bf16.mxu1 %v1595_v0 }
 0x39d   : > { %1588 = vmatprep.subr.bf16.mxu0 %v1587_v32  ;;  %1598 = vmatpush3.bf16.msra.mxu1 %v1595_v0 }
 0x3a0   : > { %1590 = vmatpush3.bf16.msra.mxu0 %v1587_v32 }
 0x469   : > { %v1499_v33 = vpop.f32.mrb[0].mxu0 }
 0x46a   : > { %v618_v34 = vpop.f32.mrb[1].mxu0 }
 0x46e   : > { %v1513_v35 = vpop.f32.mrb[2].mxu0 }
 0x46f   : > { %831 = vrot.lane.b32.xlu1 %v1513_v35, %s1791_s13  ;;  %v818_v36 = vpop.f32.mrb[3].mxu0 }
 0x470   : > { %829 = vrot.lane.b32.xlu0 %v818_v36, %s1791_s13 }
 0x4e1   : > { %v832_v37 = vpop.permute.xlu1 %831 }
 0x4e2   : > { %v830_v38 = vpop.permute.xlu0 %829  ;;  %v836_v40 = vsel %vm434_vm2, %v1499_v33, %v832_v37 }
 0x4e3   : > { %v835_v39 = vsel %vm434_vm2, %v618_v34, %v830_v38 }
 0x4e4   : > { %1522 = vmatprep.mubr.msk.f32.mxu0 %vm340_vm1, %v835_v39 }
 0x4e5   : > { %1523 = vmatmul.mubr.msk.f32.vlgmr.msra.gmra.mrb[4].mxu0 %vm340_vm1, %v836_v40 }
 0x5b8   : > { %v1524_v43 = vpop.f32.mrb[4].mxu0 }
 0x5b9   : > { %v935_v44 = vadd.f32 %v1524_v43, %v840_v42  ;;  %v929_v45 = vpop.f32.mrb[5].mxu0 }
 0x5ba   : > { %v930_v46 = vadd.f32 %v929_v45, %v840_v42 }
 0x5bb   : > { %v939_v47 = vadd.f32 %v935_v44, %v1905_v10 }
 0x5bc   : > { %v938_v48 = vadd.f32 %v930_v46, %v1898_v8 }
 0x5bd   : > { %v943_v49 = vsel %vm340_vm1, %v939_v47, 0.0 }
 0x5be   : > { %944 = vadd.xlane.f32.xlu1 %v943_v49  ;;  %v940_v50 = vsel %vm340_vm1, %v938_v48, 0.0 }
 0x5bf   : > { %941 = vadd.xlane.f32.xlu0 %v940_v50 }
 0x5cf   : > { %1694 = vrot.lane.b32.xlu1 %v1693_v1, %s1788_s19 }
 0x5d3   : > { %1704 = vrot.lane.b32.xlu1 %v1703_v13, %s1788_s19 }
 0x5d7   : > { %1709 = vrot.lane.b32.xlu1 %v1708_v17, %s1788_s19 }
 0x64b   : > { %v945_v51 = vpop.xlane.xlu1 %944 }
 0x64c   : > { %v948_v52 = vmul.f32 0.03125, %v945_v51  ;;  %v942_v53 = vpop.xlane.xlu0 %941 }
 0x64d   : > { %v947_v54 = vmul.f32 0.03125, %v942_v53 }
 0x64e   : > { %v950_v55 = vsub.f32 %v939_v47, %v948_v52  ;;  %v981_v47 = vsub.s32 4, %v1909_v12 }
 0x64f   : > { %v949_v56 = vsub.f32 %v938_v48, %v947_v54  ;;  %v1695_v31 = vpop.permute.xlu1 %1694 }
 0x650   : > { %v952_v8 = vmul.f32 %v950_v55, %v950_v55  ;;  %v1697_v32 = vunpack.i.h.bf16 %v1695_v31  ;;  %v1696_v33 = vunpack.i.l.bf16 %v1695_v31  ;;  %v982_v48 = vrot.slane %v1912_v14, %v981_v47 }
 0x651   : > { %v951_v57 = vmul.f32 %v949_v56, %v949_v56 }
 0x652   : > { %v956_v58 = vsel %vm340_vm1, %v952_v8, 0.0  ;;  %v1599_v34 = vpack.c.bf16 %v1697_v32, %v1696_v33  ;;  %v1792_v32 = vmov -1.0  }
 0x653   : > { %v953_v10 = vsel %vm340_vm1, %v951_v57, 0.0  ;;  %v1705_v39 = vpop.permute.xlu1 %1704 }
 0x654   : > { %954 = vadd.xlane.f32.xlu0 %v953_v10  ;;  %1600 = vmatprep.subr.bf16.mxu0 %v1599_v34  ;;  %v1707_v40 = vunpack.i.h.bf16 %v1705_v39  ;;  %v1706_v41 = vunpack.i.l.bf16 %v1705_v39 }
 0x655   : > { %1602 = vmatpush3.bf16.msra.mxu0 %v1599_v34 }
 0x656   : > { %v1607_v42 = vpack.c.bf16 %v1707_v40, %v1706_v41 }
 0x657   : > { %v1710_v43 = vpop.permute.xlu1 %1709 }
 0x658   : > { %957 = vadd.xlane.f32.xlu0 %v956_v58  ;;  %v1712_v44 = vunpack.i.h.bf16 %v1710_v43  ;;  %v1711_v45 = vunpack.i.l.bf16 %v1710_v43 }
 0x65a   : > { %v1611_v46 = vpack.c.bf16 %v1712_v44, %v1711_v45  ;;  %v1120_v44 = vsub.s32 5, %v1909_v12 }
 0x65c   : > { %v1121_v45 = vrot.slane %v1912_v14, %v1120_v44 }
 0x66e   : > { %1699 = vrot.lane.b32.xlu0 %v1698_v6, %s1788_s19 }
 0x6e1   : > { %v955_v18 = vpop.xlane.xlu0 %954 }
 0x6e2   : > { %v959_v2 = vmul.f32 0.03125, %v955_v18 }
 0x6e4   : > { %v961_v3 = vadd.f32 1e-12, %v959_v2 }
 0x6e5   : > { %v958_v5 = vpop.xlane.xlu0 %957 }
 0x6e6   : > { %1729 = vrsqrt.f32 %v961_v3  ;;  %v960_v4 = vmul.f32 0.03125, %v958_v5 }
 0x6e8   : > { %v962_v7 = vadd.f32 1e-12, %v960_v4 }
 0x6e9   : > { %v1700_v35 = vpop.permute.xlu0 %1699 }
 0x6ea   : > { %1731 = vrsqrt.f32 %v962_v7  ;;  %v1702_v36 = vunpack.i.h.bf16 %v1700_v35  ;;  %v1701_v37 = vunpack.i.l.bf16 %v1700_v35 }
 0x6ec   : > { %v1603_v38 = vpack.c.bf16 %v1702_v36, %v1701_v37 }
 0x6ee   : > { %1604 = vmatprep.subr.bf16.mxu0 %v1603_v38 }
 0x6ef   : > { %1606 = vmatpush3.bf16.msra.mxu0 %v1603_v38 }
 0x6f0   : > { %v1730_v22 = vpop.eup %1729  ;;  %1608 = vmatprep.subr.bf16.mxu0 %v1607_v42 }
 0x6f1   : > { %v965_v23 = vmul.f32 %v1730_v22, %v949_v56 }
 0x6f3   : > { %v971_v25 = vmul.f32 %v970_v21, %v965_v23  ;;  %1610 = vmatpush3.bf16.msra.mxu0 %v1607_v42 }
 0x6f4   : > { %v1732_v26 = vpop.eup %1731  ;;  %1612 = vmatprep.subr.bf16.mxu0 %v1611_v46 }
 0x6f5   : > { %v966_v27 = vmul.f32 %v1732_v26, %v950_v55  ;;  %v1978_v28 = vadd.f32 %v976_v24, %v971_v25 }
 0x6f7   : > { %v972_v29 = vmul.f32 %v970_v21, %v966_v27  ;;  %1533 = vmatprep.mubr.msk.f32.mxu1 %vm340_vm1, %v1978_v28  ;;  %1614 = vmatpush3.bf16.msra.mxu0 %v1611_v46 }
 0x6f9   : > { %v1982_v30 = vadd.f32 %v976_v24, %v972_v29 }
 0x6fb   : > { %1534 = vmatmul.mubr.msk.f32.vlgmr.msra.gmra.mrb[6].mxu1 %vm340_vm1, %v1982_v30 }
 0x7ce   : > { %v1535_v49 = vpop.f32.mrb[6].mxu1 }
 0x7cf   : > { %v1061_v50 = vadd.f32 %v1535_v49, %v982_v48  ;;  %v1055_v51 = vpop.f32.mrb[7].mxu1 }
 0x7d0   : > { %v1056_v52 = vadd.f32 %v1055_v51, %v982_v48 }
 0x7d1   : > { %v1067_v53 = vmul.f32 0.70710677, %v1061_v50  ;;  %v1065_v41 = vmul.f32 0.5, %v1061_v50 }
 0x7d2   : > { %v1066_v54 = vmul.f32 0.70710677, %v1056_v52  ;;  %v1064_v39 = vmul.f32 0.5, %v1056_v52 }
 0x7d3   : > { %v1073_v55 = vand.u32 2147483647, %v1067_v53  ;;  %vm1069_vm4 = vcmp.ge.f32.partialorder %v1067_v53, 0.0 }
 0x7d4   : > { %v1072_v56 = vand.u32 2147483647, %v1066_v54  ;;  %vm1068_vm5 = vcmp.ge.f32.partialorder %v1066_v54, 0.0  ;;  %v1071_v33 = vsel %vm1069_vm4, 1.0, %v1792_v32 }
 0x7d5   : > { %v1075_v57 = vmul.f32 0.3275911, %v1073_v55  ;;  %v1101_v59 = vsub.f32 0.0, %v1073_v55  ;;  %v1070_v36 = vsel %vm1068_vm5, 1.0, %v1792_v32 }
 0x7d6   : > { %v1074_v10 = vmul.f32 0.3275911, %v1072_v56  ;;  %v1100_v60 = vsub.f32 0.0, %v1072_v56 }
 0x7d7   : > { %v1077_v8 = vadd.f32 1.0, %v1075_v57  ;;  %v1103_v62 = vmul.f32 %v1101_v59, %v1073_v55 }
 0x7d8   : > { %v1076_v58 = vadd.f32 1.0, %v1074_v10  ;;  %v1102_v1 = vmul.f32 %v1100_v60, %v1072_v56 }
 0x7d9   : > { %1733 = vrcp.f32 %v1077_v8  ;;  %v1106_v11 = vmul.f32 1.442695, %v1103_v62 }
 0x7da   : > { %1735 = vrcp.f32 %v1076_v58  ;;  %v1104_v16 = vmul.f32 1.442695, %v1102_v1 }
 0x7db   : > { %1737 = vpow2.f32 %v1106_v11 }
 0x7dc   : > { %1739 = vpow2.f32 %v1104_v16 }
 0x7e3   : > { %v1734_v61 = vpop.eup %1733 }
 0x7e4   : > { %v1736_v63 = vpop.eup %1735  ;;  %v1083_v0 = vmul.f32 1.0614054, %v1734_v61 }
 0x7e5   : > { %v1082_v6 = vmul.f32 1.0614054, %v1736_v63  ;;  %v1738_v24 = vpop.eup %1737 }
 0x7e6   : > { %v1085_v9 = vadd.f32 -1.4531521, %v1083_v0  ;;  %v1740_v26 = vpop.eup %1739 }
 0x7e7   : > { %v1084_v13 = vadd.f32 -1.4531521, %v1082_v6  ;;  %v1266_v6 = vsub.s32 6, %v1909_v12 }
 0x7e8   : > { %v1087_v15 = vmul.f32 %v1734_v61, %v1085_v9  ;;  %v1272_v9 = vsub.s32 7, %v1909_v12 }
 0x7e9   : > { %v1086_v17 = vmul.f32 %v1736_v63, %v1084_v13  ;;  %v1267_v11 = vrot.slane %v1912_v14, %v1266_v6 }
 0x7ea   : > { %v1089_v18 = vadd.f32 1.4214138, %v1087_v15  ;;  %v1273_v15 = vrot.slane %v1912_v14, %v1272_v9 }
 0x7eb   : > { %v1088_v2 = vadd.f32 1.4214138, %v1086_v17 }
 0x7ec   : > { %v1091_v3 = vmul.f32 %v1734_v61, %v1089_v18 }
 0x7ed   : > { %v1090_v5 = vmul.f32 %v1736_v63, %v1088_v2 }
 0x7ee   : > { %v1093_v4 = vadd.f32 -0.28449672, %v1091_v3 }
 0x7ef   : > { %v1092_v7 = vadd.f32 -0.28449672, %v1090_v5 }
 0x7f0   : > { %v1095_v19 = vmul.f32 %v1734_v61, %v1093_v4 }
 0x7f1   : > { %v1094_v20 = vmul.f32 %v1736_v63, %v1092_v7 }
 0x7f2   : > { %v1097_v21 = vadd.f32 0.2548296, %v1095_v19 }
 0x7f3   : > { %v1096_v22 = vadd.f32 0.2548296, %v1094_v20 }
 0x7f4   : > { %v1099_v23 = vmul.f32 %v1734_v61, %v1097_v21 }
 0x7f5   : > { %v1098_v25 = vmul.f32 %v1736_v63, %v1096_v22 }
 0x7f6   : > { %v1109_v27 = vmul.f32 %v1738_v24, %v1099_v23 }
 0x7f7   : > { %v1108_v29 = vmul.f32 %v1740_v26, %v1098_v25 }
 0x7f8   : > { %v1111_v31 = vsub.f32 1.0, %v1109_v27 }
 0x7f9   : > { %v1110_v34 = vsub.f32 1.0, %v1108_v29 }
 0x7fa   : > { %v1113_v35 = vmul.f32 %v1111_v31, %v1071_v33 }
 0x7fb   : > { %v1112_v37 = vmul.f32 %v1110_v34, %v1070_v36 }
 0x7fc   : > { %v1115_v38 = vadd.f32 1.0, %v1113_v35 }
 0x7fd   : > { %v1114_v40 = vadd.f32 1.0, %v1112_v37 }
 0x7fe   : > { %v1117_v43 = vmul.f32 %v1115_v38, %v1065_v41 }
 0x7ff   : > { %v1116_v42 = vmul.f32 %v1114_v40, %v1064_v39 }
 0x801   : > { %1552 = vmatprep.mubr.msk.f32.mxu0 %vm1154_vm6, %v1116_v42 }
 0x802   : > { %1553 = vmatmul.mubr.msk.f32.vlgmr.msra.gmra.mrb[6].mxu0 %vm1154_vm6, %v1117_v43 }
 0x8d5   : > { %v1554_v46 = vpop.f32.mrb[6].mxu0 }
 0x8d6   : > { %v1233_v47 = vadd.f32 %v1554_v46, %v1121_v45  ;;  %v1227_v48 = vpop.f32.mrb[7].mxu0 }
 0x8d7   : > { %v1228_v49 = vadd.f32 %v1227_v48, %v1121_v45 }
 0x8d8   : > { %v1237_v51 = vadd.f32 %v1233_v47, %v1982_v30 }
 0x8d9   : > { %v1236_v53 = vadd.f32 %v1228_v49, %v1978_v28 }
 0x8da   : > { %v1241_v52 = vsel %vm340_vm1, %v1237_v51, 0.0 }
 0x8db   : > { %1242 = vadd.xlane.f32.xlu1 %v1241_v52  ;;  %v1238_v50 = vsel %vm340_vm1, %v1236_v53, 0.0 }
 0x8dc   : > { %1239 = vadd.xlane.f32.xlu0 %v1238_v50 }
 0x968   : > { %v1243_v54 = vpop.xlane.xlu1 %1242 }
 0x969   : > { %v1245_v55 = vmul.f32 0.03125, %v1243_v54  ;;  %v1240_v56 = vpop.xlane.xlu0 %1239 }
 0x96a   : > { %v1244_v57 = vmul.f32 0.03125, %v1240_v56 }
 0x96b   : > { %v1247_v10 = vsub.f32 %v1237_v51, %v1245_v55 }
 0x96c   : > { %v1246_v8 = vsub.f32 %v1236_v53, %v1244_v57 }
 0x96d   : > { %v1249_v60 = vmul.f32 %v1247_v10, %v1247_v10 }
 0x96e   : > { %v1248_v58 = vmul.f32 %v1246_v8, %v1246_v8 }
 0x96f   : > { %v1253_v30 = vsel %vm340_vm1, %v1249_v60, 0.0 }
 0x970   : > { %v1250_v59 = vsel %vm340_vm1, %v1248_v58, 0.0 }
 0x971   : > { %1251 = vadd.xlane.f32.xlu0 %v1250_v59 }
 0x975   : > { %1254 = vadd.xlane.f32.xlu0 %v1253_v30 }
 0x9fe   : > { %v1252_v28 = vpop.xlane.xlu0 %1251 }
 0x9ff   : > { %v1256_v61 = vmul.f32 0.03125, %v1252_v28 }
 0xa01   : > { %v1258_v62 = vadd.f32 1e-12, %v1256_v61 }
 0xa02   : > { %v1255_v63 = vpop.xlane.xlu0 %1254 }
 0xa03   : > { %1741 = vrsqrt.f32 %v1258_v62  ;;  %v1257_v0 = vmul.f32 0.03125, %v1255_v63 }
 0xa05   : > { %v1259_v1 = vadd.f32 1e-12, %v1257_v0 }
 0xa07   : > { %1743 = vrsqrt.f32 %v1259_v1 }
 0xa0d   : > { %v1742_v13 = vpop.eup %1741 }
 0xa0e   : > { %v1262_v16 = vmul.f32 %v1742_v13, %v1246_v8 }
 0xa10   : > { %v1268_v17 = vmul.f32 %v1267_v11, %v1262_v16 }
 0xa11   : > { %v1744_v18 = vpop.eup %1743 }
 0xa12   : > { %v1274_v2 = vadd.f32 %v1273_v15, %v1268_v17  ;;  %v1263_v3 = vmul.f32 %v1744_v18, %v1247_v10 }
 0xa14   : > { %1276 = vst.msk [vmem:[%s1868_s10] sm:$0xff] %vm340_vm1, %v1274_v2  ;;  %v1269_v5 = vmul.f32 %v1267_v11, %v1263_v3 }
 0xa16   : > { %v1275_v4 = vadd.f32 %v1273_v15, %v1269_v5 }
 0xa18   : > { %1277 = vst.msk [vmem:[%s1868_s10 + $0x8] sm:$0xff] %vm340_vm1, %v1275_v4 }
 0xa19 PF: > { %s15_s22 = sadd.s32 1, %s1783_s22   ;;  %s2026_s18 = smov %s1775_s20 }
 0xa1a   : > { %p12_p9 = scmp.ge.s32.totalorder %s15_s22, 6   ;;  %s2027_s19 = smov %s1779_s21 }
 0xa1b   : > { %s2028_s20 = smov %s2031_s23  ;;  %s2029_s21 = smov %s2035_s24 }
 0xa1c   :  { %14 = sbr.rel (!%p12_p9) target bundleno = 3 (0x3), region = 86 }

// kernel: ed_bert_forward.3
= control target key start
LH: loop header
LB: loop body
LE: loop exit
PB: predicated region body
PF: predicated region fallthrough
CT: control target
= control target key end

     0   :  { %vm53_vm0 = vcmask 261120   ;;  %v852_v7 = vmov 0   ;;  %s1117_s0 = inlined_call_operand.vmem [shape: f32[32,32], index: 0, kind: input, shape index: {}]   ;;  %s1118_s1 = inlined_call_operand.vmem [shape: f32[32,64], index: 1, kind: input, shape index: {}]   ;;  %s1119_s2 = inlined_call_operand.vmem [shape: f32[1,64], index: 2, kind: input, shape index: {}]   ;;  %s1120_s3 = inlined_call_operand.vmem [shape: s32[32,1], index: 3, kind: input, shape index: {}]   ;;  %s1121_s4 = inlined_call_operand.vmem [shape: f32[64,4], index: 4, kind: input, shape index: {}]   ;;  %s1122_s5 = inlined_call_operand.vmem [shape: f32[2,32], index: 5, kind: input, shape index: {}]   ;;  %s1123_s6 = inlined_call_operand.vmem [shape: f32[8,32], index: 6, kind: input, shape index: {}]   ;;  %s1124_s7 = inlined_call_operand.vmem [shape: f32[32,2], index: 7, kind: input, shape index: {}]   ;;  %s1125_s8 = inlined_call_operand.vmem [shape: f32[1,2], index: 8, kind: input, shape index: {}]   ;;  %s1126_s9 = inlined_call_operand.vmem [shape: s32[8,1], index: 9, kind: input, shape index: {}]   ;;  %s1127_s10 = inlined_call_operand.hbm [shape: f32[1,1], index: 10, kind: output, shape index: {0}]   ;;  %s1128_s11 = inlined_call_operand.vmem [shape: f32[2,4], index: 11, kind: output, shape index: {1}]  }
   0x1   :  { %v42_v0 = vld [vmem:[%s1118_s1] sm:$0xff]  ;;  %v43_v1 = vld [vmem:[%s1118_s1 + $0x8] sm:$0xff]  ;;  %v44_v2 = vld [vmem:[%s1118_s1 + $0x10] sm:$0xff]  ;;  %806 = vset.pattern.permute.xlu1 %v852_v7  ;;  %807 = vset.pattern.permute.xlu0 %v852_v7 }
   0x2   :  { %v759_v3 = vpack.c.bf16 %v43_v1, %v42_v0  ;;  %v45_v4 = vld [vmem:[%s1118_s1 + $0x18] sm:$0xff]  ;;  %v932_v5 = vld [vmem:[%s1117_s0] sm:$0xff]  ;;  %v937_v6 = vld [vmem:[%s1117_s0 + $0x8] sm:$0xff] }
   0x3   :  { %v763_v8 = vpack.c.bf16 %v45_v4, %v44_v2  ;;  %698 = vmatprep.mubr.msk.f32.mxu0 %vm53_vm0, %v932_v5  ;;  %v790_v9 = vpack.c.bf16 %v937_v6, %v932_v5  ;;  %v946_v10 = vld [vmem:[%s1117_s0 + $0x10] sm:$0xff]  ;;  %v951_v11 = vld [vmem:[%s1117_s0 + $0x18] sm:$0xff]  ;;  %v151_v12 = vld [vmem:[%s1120_s3] sm:$0xff] }
   0x4   :  { %760 = vmatprep.subr.bf16.mxu0 %v759_v3  ;;  %v793_v13 = vpack.c.bf16 %v951_v11, %v946_v10  ;;  %207 = vperm.xlu1 %806, %v151_v12   ;;  %v252_v14 = vld [vmem:[%s1121_s4] sm:$0xff]  ;;  %v253_v15 = vld [vmem:[%s1121_s4 + $0x8] sm:$0xff]  ;;  %v254_v16 = vld [vmem:[%s1121_s4 + $0x10] sm:$0xff] }
   0x5   :  { %762 = vmatpush3.bf16.msra.mxu0 %v759_v3  ;;  %v767_v17 = vpack.c.bf16 %v253_v15, %v252_v14  ;;  %v255_v18 = vld [vmem:[%s1121_s4 + $0x18] sm:$0xff]  ;;  %v256_v20 = vld [vmem:[%s1121_s4 + $0x20] sm:$0xff]  ;;  %v257_v21 = vld [vmem:[%s1121_s4 + $0x28] sm:$0xff] }
   0x6   :  { %764 = vmatprep.subr.bf16.mxu0 %v763_v8  ;;  %v771_v19 = vpack.c.bf16 %v255_v18, %v254_v16 }
   0x7   :  { %17 = vsyncpa [#allocation3], 0  ;;  %768 = vmatprep.subr.bf16.mxu1 %v767_v17  ;;  %v775_v22 = vpack.c.bf16 %v257_v21, %v256_v20  ;;  %v258_v23 = vld [vmem:[%s1121_s4 + $0x30] sm:$0xff]  ;;  %v259_v24 = vld [vmem:[%s1121_s4 + $0x38] sm:$0xff]  ;;  %vm155_vm1 = vcmask 523264   ;;  %v853_v42 = vmov 0.0|0.0  }
   0x8   :  { %770 = vmatpush3.bf16.msra.mxu1 %v767_v17  ;;  %v779_v25 = vpack.c.bf16 %v259_v24, %v258_v23  ;;  %v642_v26 = vld [vmem:[%s1119_s2] ss:$0 sm:$0xff]  ;;  %v153_v39 = vld [vmem:[%s1120_s3 + $0x10] sm:$0xff]  ;;  %v154_v40 = vld [vmem:[%s1120_s3 + $0x18] sm:$0xff]  ;;  %vm854_vm2 = vmmov 0   ;;  %v855_v43 = vmov 0.0  }
   0x9   :  { %766 = vmatpush3.bf16.msra.mxu0 %v763_v8  ;;  %772 = vmatprep.subr.bf16.mxu1 %v771_v19  ;;  %v591_v41 = vld [vmem:[%s1126_s9] sm:$0xff]  ;;  %v508_v5 = vld [vmem:[%s1124_s7 + $0x8] sm:$0xff]  ;;  %v509_v8 = vld [vmem:[%s1124_s7 + $0x10] sm:$0xff]  ;;  %vm431_vm3 = vcmask 25600   ;;  %vm592_vm4 = vcmask 15360   ;;  %vm622_vm10 = vcmask 0  }
   0xa   :  { %783 = vmatprep.subr.bf16.mxu0 %v853_v42  ;;  %v357_v3 = vld [vmem:[%s1122_s5] sm:$0x3]  ;;  %v152_v20 = vld [vmem:[%s1120_s3 + $0x8] sm:$0xff]  ;;  %s856_s3 = smov [#allocation2]  }
   0xb   :  { %v433_v4 = vld [vmem:[%s1123_s6] sm:$0xff] }
   0xc   :  { %699 = vmatmul.mubr.msk.f32.vlgmr.msra.gmra.mrb[0].mxu0 %vm53_vm0, %v937_v6  ;;  %774 = vmatpush3.bf16.msra.mxu1 %v771_v19  ;;  %v507_v7 = vld [vmem:[%s1124_s7] sm:$0xff] }
   0xd   :  { %701 = vmatprep.mubr.msk.f32.mxu0 %vm53_vm0, %v946_v10  ;;  %776 = vmatprep.subr.bf16.mxu1 %v775_v22  ;;  %v796_v6 = vpack.c.bf16 %v508_v5, %v507_v7  ;;  %v653_v15 = vld [vmem:[%s1125_s8] ss:$0 sm:$0xff]  ;;  %s630_s8 = sshll.u32 %s856_s3, 4  ;;  %s631_s8 = int_to_ptr.vmem [resolvable:$true] %s630_s8 }
   0xe   :  { %s832_s1 = scalar_lea.vmem %s631_s8, 32  ;;  %p833_p1 = scmp.lt.s32.totalorder %s631_s8, %s631_s8 }
  0x10   :  { %702 = vmatmul.mubr.msk.f32.gmra.mrb[2].mxu0 %vm53_vm0, %v951_v11  ;;  %778 = vmatpush3.bf16.msra.mxu1 %v775_v22 }
  0x11   :  { %780 = vmatprep.subr.bf16.mxu1 %v779_v25  ;;  %734 = vmatprep.mubr.msk.f32.mxu0 %vm854_vm2, %v855_v43 }
  0x14   :  { %782 = vmatpush3.bf16.msra.mxu1 %v779_v25 }
  0x15   :  { %795 = vmatprep.subr.bf16.mxu1 %v853_v42 }
  0x83   :  { %v1026_v44 = vpop.permute.xlu1 %207 }
  0xdf   :  { %v700_v27 = vpop.f32.mrb[0].mxu0 }
  0xe0   :  { %v991_v28 = vadd.f32 %v700_v27, %v642_v26  ;;  %v132_v29 = vpop.f32.mrb[1].mxu0 }
  0xe1   :  { %v993_v30 = vadd.f32 %v642_v26, %v132_v29  ;;  %v204_v29 = vlaneseq }
  0xe2   :  { %v159_v31 = vsel %vm155_vm1, %v991_v28, -inf }
  0xe3   :  { %160 = vmax.xlane.f32.xlu0 %v159_v31  ;;  %v703_v32 = vpop.f32.mrb[2].mxu0  ;;  %720 = vmatprep.mubr.msk.f32.mxu1 %vm155_vm1, %v993_v30  ;;  %v156_v37 = vsel %vm155_vm1, %v993_v30, -inf }
  0xe4   :  { %v999_v33 = vadd.f32 %v703_v32, %v642_v26  ;;  %v142_v34 = vpop.f32.mrb[3].mxu0  ;;  %721 = vmatmul.mubr.msk.f32.vlgmr.msra.gmra.mrb[0].mxu1 %vm155_vm1, %v991_v28 }
  0xe5   :  { %v1003_v35 = vadd.f32 %v642_v26, %v142_v34  ;;  %797 = vmatpush3.bf16.msra.mxu1 %v796_v6  ;;  %v205_v34 = vand.u32 127, %v204_v29 }
  0xe6   :  { %v165_v36 = vsel %vm155_vm1, %v999_v33, -inf  ;;  %798 = vmatprep.subr.bf16.mxu1 %v853_v42 }
  0xe7   :  { %166 = vmax.xlane.f32.xlu1 %v165_v36  ;;  %723 = vmatprep.mubr.msk.f32.mxu1 %vm155_vm1, %v1003_v35  ;;  %v162_v38 = vsel %vm155_vm1, %v1003_v35, -inf  ;;  %vm218_vm7 = vcmp.eq.s32.totalorder %v205_v34, %v1026_v44 }
  0xe8   :  { %157 = vmax.xlane.f32.xlu0 %v156_v37  ;;  %724 = vmatmul.mubr.msk.f32.gmra.mrb[2].mxu1 %vm155_vm1, %v999_v33 }
  0xe9   :  { %756 = vmatprep.mubr.msk.f32.mxu1 %vm854_vm2, %v855_v43 }
  0xeb   :  { %163 = vmax.xlane.f32.xlu1 %v162_v38 }
  0xfc   :  { %213 = vperm.xlu1 %806, %v153_v39  }
 0x100   :  { %216 = vperm.xlu1 %806, %v154_v40  }
 0x104   :  { %606 = vperm.xlu1 %806, %v591_v41  }
 0x170   :  { %v1028_v45 = vpop.xlane.xlu0 %160 }
 0x171   :  { %v169_v21 = vsub.f32 %v991_v28, %v1028_v45 }
 0x173   :  { %v174_v22 = vmul.f32 1.442695, %v169_v21 }
 0x174   :  { %v1030_v46 = vpop.xlane.xlu1 %166 }
 0x175   :  { %v1032_v47 = vpop.xlane.xlu0 %157  ;;  %v171_v49 = vsub.f32 %v999_v33, %v1030_v46 }
 0x176   :  { %v168_v48 = vsub.f32 %v993_v30, %v1032_v47 }
 0x177   :  { %v178_v54 = vmul.f32 1.442695, %v171_v49 }
 0x178   :  { %v172_v50 = vmul.f32 1.442695, %v168_v48  ;;  %v1038_v51 = vpop.xlane.xlu1 %163 }
 0x179   :  { %v170_v52 = vsub.f32 %v1003_v35, %v1038_v51 }
 0x17a   :  { %808 = vpow2.f32 %v172_v50 }
 0x17b   :  { %v176_v53 = vmul.f32 1.442695, %v170_v52 }
 0x17c   :  { %v214_v25 = vpop.permute.xlu1 %213 }
 0x17d   :  { %810 = vpow2.f32 %v176_v53  ;;  %vm220_vm8 = vcmp.eq.s32.totalorder %v205_v34, %v214_v25 }
 0x17e   :  { %812 = vpow2.f32 %v178_v54  ;;  %v224_v49 = vsel %vm220_vm8, %v1003_v35, 0.0 }
 0x17f   :  { %814 = vpow2.f32 %v174_v22 }
 0x180   :  { %v217_v32 = vpop.permute.xlu1 %216 }
 0x181   :  { %vm221_vm5 = vcmp.eq.s32.totalorder %v205_v34, %v217_v32 }
 0x182   :  { %v225_v39 = vsel %vm221_vm5, %v999_v33, 0.0  ;;  %v232_v33 = vsel %vm155_vm1, %v224_v49, 0.0 }
 0x183   :  { %v235_v41 = vsel %vm155_vm1, %v225_v39, 0.0 }
 0x184   :  { %v809_v55 = vpop.eup %808 }
 0x185   :  { %v180_v56 = vsel %vm155_vm1, %v809_v55, 0.0 }
 0x186   :  { %181 = vadd.xlane.f32.xlu1 %v180_v56 }
 0x187   :  { %v811_v57 = vpop.eup %810 }
 0x188   :  { %v186_v58 = vsel %vm155_vm1, %v811_v57, 0.0  ;;  %v813_v59 = vpop.eup %812 }
 0x189   :  { %v189_v60 = vsel %vm155_vm1, %v813_v59, 0.0  ;;  %v815_v23 = vpop.eup %814 }
 0x18a   :  { %187 = vadd.xlane.f32.xlu1 %v186_v58  ;;  %v183_v24 = vsel %vm155_vm1, %v815_v23, 0.0 }
 0x18e   :  { %190 = vadd.xlane.f32.xlu1 %v189_v60 }
 0x1b7   :  { %v722_v61 = vpop.f32.mrb[0].mxu1 }
 0x1b8   :  { %v338_v62 = vpop.f32.mrb[1].mxu1 }
 0x1b9   :  { %v784_v63 = vpack.c.bf16 %v722_v61, %v338_v62 }
 0x1bb   :  { %v725_v0 = vpop.f32.mrb[2].mxu1  ;;  %785 = vmatpush3.bf16.msra.mxu0 %v784_v63 }
 0x1bc   :  { %v348_v1 = vpop.f32.mrb[3].mxu1  ;;  %786 = vmatprep.subr.bf16.mxu0 %v853_v42 }
 0x1bd   :  { %v787_v2 = vpack.c.bf16 %v725_v0, %v348_v1 }
 0x1bf   :  { %788 = vmatpush3.bf16.msra.mxu0 %v787_v2 }
 0x1c0   :  { %789 = vmatprep.subr.bf16.mxu0 %v853_v42 }
 0x1c2   :  { %735 = vmatmul.mubr.msk.f32.vlgmr.msra.gmra.mrb[4].mxu0 %vm53_vm0, %v357_v3 }
 0x1c3   :  { %791 = vmatpush3.bf16.msra.mxu0 %v790_v9  ;;  %745 = vmatprep.mubr.msk.f32.mxu0 %vm854_vm2, %v855_v43  ;;  %v510_v9 = vld [vmem:[%s1124_s7 + $0x18] sm:$0xff]  ;;  %v222_v43 = vsel %vm218_vm7, %v993_v30, 0.0 }
 0x1c4   :  { %792 = vmatprep.subr.bf16.mxu0 %v853_v42  ;;  %v799_v10 = vpack.c.bf16 %v510_v9, %v509_v8  ;;  %v226_v48 = vsel %vm155_vm1, %v222_v43, 0.0 }
 0x1c6   :  { %800 = vmatpush3.bf16.msra.mxu1 %v799_v10 }
 0x1c7   :  { %794 = vmatpush3.bf16.msra.mxu0 %v793_v13 }
 0x1ca   :  { %746 = vmatmul.mubr.msk.f32.vlgmr.msra.gmra.mrb[6].mxu0 %vm53_vm0, %v433_v4 }
 0x295   :  { %v427_v11 = vpop.f32.mrb[4].mxu0 }
 0x296   :  { %432 = vst.msk [vmem:[%s1128_s11] sm:$0x3] %vm431_vm3, %v427_v11  ;;  %v736_v12 = vpop.f32.mrb[5].mxu0  ;;  %s828_s11 = scalar_lea.vmem %s631_s8, 16 }
 0x297   :  { %p829_p0 = scmp.ne.s32.totalorder %s631_s8, %s828_s11  ;;  %p834_p2 = scmp.lt.s32.totalorder %s832_s1, %s828_s11 }
 0x299   :  { %p835_p3 = por %p834_p2, %p833_p1 }
 0x29b   :  { %p836_p4 = pnand %p835_p3, %p829_p0 }
 0x29d   :  { %v503_v13 = vpop.f32.mrb[6].mxu0 }
 0x29e   :  { %v747_v14 = vpop.f32.mrb[7].mxu0  ;;  %757 = vmatmul.mubr.msk.f32.vlgmr.msra.gmra.mrb[4].mxu1 %vm53_vm0, %v503_v13 }
 0x371   :  { %v587_v16 = vpop.f32.mrb[4].mxu1 }
 0x372   :  { %v588_v17 = vadd.f32 %v653_v15, %v587_v16  ;;  %v758_v18 = vpop.f32.mrb[5].mxu1 }
 0x374   :  { %v593_v19 = vsel %vm592_vm4, %v588_v17, -inf }
 0x375   :  { %594 = vmax.xlane.f32.xlu0 %v593_v19 }
 0x38b   :  { %210 = vperm.xlu0 %807, %v152_v20  }
 0x3aa   :  { %184 = vadd.xlane.f32.xlu0 %v183_v24 }
 0x402   :  { %v1086_v26 = vpop.xlane.xlu0 %594 }
 0x403   :  { %v596_v27 = vsub.f32 %v588_v17, %v1086_v26 }
 0x405   :  { %v597_v31 = vmul.f32 1.442695, %v596_v27 }
 0x407   :  { %816 = vpow2.f32 %v597_v31 }
 0x40a   :  { %v211_v36 = vpop.permute.xlu0 %210 }
 0x40b   :  { %vm219_vm6 = vcmp.eq.s32.totalorder %v205_v34, %v211_v36 }
 0x40c   :  { %v223_v37 = vsel %vm219_vm6, %v991_v28, 0.0  ;;  %v607_v28 = vpop.permute.xlu1 %606 }
 0x40d   :  { %v229_v38 = vsel %vm155_vm1, %v223_v37, 0.0  ;;  %vm608_vm9 = vcmp.eq.s32.totalorder %v205_v34, %v607_v28 }
 0x40e   :  { %230 = vadd.xlane.f32.xlu0 %v229_v38  ;;  %v609_v44 = vsel %vm608_vm9, %v588_v17, 0.0 }
 0x40f   :  { %v610_v50 = vsel %vm592_vm4, %v609_v44, 0.0 }
 0x410   :  { %v182_v52 = vpop.xlane.xlu1 %181 }
 0x411   :  { %v817_v40 = vpop.eup %816  ;;  %818 = vlog2.f32 %v182_v52 }
 0x412   :  { %236 = vadd.xlane.f32.xlu0 %v235_v41  ;;  %v599_v42 = vsel %vm592_vm4, %v817_v40, 0.0 }
 0x413   :  { %600 = vadd.xlane.f32.xlu1 %v599_v42 }
 0x414   :  { %v188_v53 = vpop.xlane.xlu1 %187 }
 0x417   :  { %227 = vadd.xlane.f32.xlu1 %v226_v48 }
 0x418   :  { %v191_v30 = vpop.xlane.xlu1 %190 }
 0x41b   :  { %233 = vadd.xlane.f32.xlu1 %v232_v33  ;;  %v819_v55 = vpop.eup %818 }
 0x41c   :  { %v193_v57 = vmul.f32 0.6931472, %v819_v55 }
 0x41e   :  { %v200_v63 = vadd.f32 %v193_v57, %v1032_v47 }
 0x41f   :  { %611 = vadd.xlane.f32.xlu1 %v610_v50 }
 0x437   :  { %v185_v54 = vpop.xlane.xlu0 %184 }
 0x438   :  { %820 = vlog2.f32 %v185_v54 }
 0x439   :  { %822 = vlog2.f32 %v188_v53 }
 0x43a   :  { %824 = vlog2.f32 %v191_v30 }
 0x442   :  { %v821_v56 = vpop.eup %820 }
 0x443   :  { %v823_v35 = vpop.eup %822  ;;  %v195_v59 = vmul.f32 0.6931472, %v821_v56 }
 0x444   :  { %v825_v60 = vpop.eup %824  ;;  %v197_v62 = vmul.f32 0.6931472, %v823_v35 }
 0x445   :  { %v199_v1 = vmul.f32 0.6931472, %v825_v60  ;;  %v201_v2 = vadd.f32 %v195_v59, %v1028_v45 }
 0x446   :  { %v202_v7 = vadd.f32 %v197_v62, %v1038_v51 }
 0x447   :  { %v203_v8 = vadd.f32 %v199_v1, %v1030_v46 }
 0x49b   :  { %v231_v61 = vpop.xlane.xlu0 %230 }
 0x49c   :  { %v239_v4 = vsub.f32 %v201_v2, %v231_v61 }
 0x49f   :  { %v237_v5 = vpop.xlane.xlu0 %236 }
 0x4a0   :  { %v601_v58 = vpop.xlane.xlu1 %600  ;;  %v241_v12 = vsub.f32 %v203_v8, %v237_v5 }
 0x4a1   :  { %826 = vlog2.f32 %v601_v58 }
 0x4a4   :  { %v228_v0 = vpop.xlane.xlu1 %227 }
 0x4a5   :  { %v238_v3 = vsub.f32 %v200_v63, %v228_v0 }
 0x4a7   :  { %v242_v9 = vadd.f32 %v239_v4, %v238_v3 }
 0x4a8   :  { %v234_v6 = vpop.xlane.xlu1 %233 }
 0x4a9   :  { %v240_v10 = vsub.f32 %v202_v7, %v234_v6 }
 0x4ab   :  { %v827_v11 = vpop.eup %826  ;;  %v243_v13 = vadd.f32 %v242_v9, %v240_v10 }
 0x4ac   :  { %v603_v14 = vmul.f32 0.6931472, %v827_v11  ;;  %v612_v17 = vpop.xlane.xlu1 %611 }
 0x4ad   :  { %v244_v15 = vadd.f32 %v243_v13, %v241_v12 }
 0x4ae   :  { %v604_v47 = vadd.f32 %v603_v14, %v1086_v26 }
 0x4af   :  { %v245_v16 = vrot.slane %v244_v15, 4 }
 0x4b0   :  { %v613_v45 = vsub.f32 %v604_v47, %v612_v17 }
 0x4b1   :  { %v246_v18 = vadd.f32 %v245_v16, %v244_v15 }
 0x4b2   :  { %v614_v19 = vrot.slane %v613_v45, 4 }
 0x4b3   :  { %v247_v20 = vrot.slane %v246_v18, 2 }
 0x4b4   :  { %v615_v51 = vadd.f32 %v614_v19, %v613_v45 }
 0x4b5   :  { %v248_v21 = vadd.f32 %v247_v20, %v246_v18 }
 0x4b6   :  { %v616_v22 = vrot.slane %v615_v51, 2 }
 0x4b7   :  { %v249_v23 = vrot.slane %v248_v21, 1 }
 0x4b8   :  { %v617_v46 = vadd.f32 %v616_v22, %v615_v51 }
 0x4b9   :  { %v250_v25 = vadd.f32 %v249_v23, %v248_v21 }
 0x4ba   :  { %v618_v24 = vrot.slane %v617_v46, 1 }
 0x4bb   :  { %v251_v29 = vmul.f32 0.03125, %v250_v25 }
 0x4bc   :  { %v619_v27 = vadd.f32 %v618_v24, %v617_v46 }
 0x4be   :  { %v620_v31 = vmul.f32 0.125, %v619_v27 }
 0x4c0   :  { %v621_v26 = vadd.f32 %v620_v31, %v251_v29 }
 0x4c2   :  { %623 = vst.msk [vmem:[#allocation2] sm:$0x1] %vm622_vm10, %v621_v26 }
 0x4c3   :  { %839 = shalt.err (!%p836_p4)
}
 0x4c4   :  { %s840_s2 = scalar_lea.hbm %s1127_s10, 16 }
 0x4c5   :  { %p841_p5 = scmp.ne.s32.totalorder %s1127_s10, %s840_s2  ;;  %p844_p6 = scmp.lt.u32.totalorder %s840_s2, %s1127_s10 }
 0x4c7   :  { %p846_p7 = pnand %p844_p6, %p841_p5 }
 0x4c9   :  { %849 = shalt.err (!%p846_p7)
}
 0x4ca   :  { %633 = dma.vmem_to_hbm [thread:$0]  %s631_s8, 16, %s1127_s10, [#allocation3]  }
 0x4cb   :  { %850 = dma.done.wait [#allocation3], 16  }
 0x4cc   :  { %851 = vsyncadd [#allocation3], 4294967280 }
 0x4cd   :  { %641 = vsyncpa [#allocation3], 1 }

</bundles_post_ra>
